<compile_context>
chip_gen: v7x
topology: tpu7x:2x2x1
jax: 0.10.0
libtpu: 0.0.40
codegen_flags: <defaults>
</compile_context>

<pallas_src>
import jax
import jax.numpy as jnp
from jax.experimental import pallas as pl
from jax.experimental.pallas import tpu as pltpu

LANE = 128
SUBLANE = 8


def _round_up(x, m):
    return (x + m - 1) // m * m


# ---------------------------------------------------------------------------
# Pallas kernel: fused bidirectional LSTM recurrence.
# grid = (2, n_time_blocks)   (direction "parallel", time "arbitrary")
#   gx_ref  : (T_BLK, Bp, 4*Hp)  precomputed x-gates (+bias) for this direction
#   whh_ref : (1, Hp, 4*Hp)      pre-transposed hidden->gate weights
#   out_ref : (T_BLK, Bp, Hp)    hidden states, written at original time index
#   h_scr/c_scr : (Bp, Hp)       recurrent carries (persist across time blocks)
# ---------------------------------------------------------------------------
def bilstm_recurrence_kernel(gx_ref, whh_ref, out_ref, h_scr, c_scr):
    d = pl.program_id(0)          # direction: 0 = forward, 1 = backward
    tb = pl.program_id(1)         # time block (sequential)

    @pl.when(tb == 0)
    def _():
        # init_hidden / init_c parameters are zeros in the module __init__
        h_scr[...] = jnp.zeros_like(h_scr)
        c_scr[...] = jnp.zeros_like(c_scr)

    whh = whh_ref[0]              # (Hp, 4*Hp), already transposed in wrapper
    t_blk = gx_ref.shape[0]
    hp = h_scr.shape[-1]

    def step(s, carry):
        # forward walks s = 0 .. t_blk-1, backward walks s = t_blk-1 .. 0
        s_eff = s + d * (t_blk - 1 - 2 * s)
        gates = gx_ref[s_eff] + jnp.dot(h_scr[...], whh,
                                        preferred_element_type=jnp.float32)
        # PyTorch gate order: i, f, g, o ; each gate slice is lane-aligned (Hp)
        i_g = jax.nn.sigmoid(gates[:, 0 * hp:1 * hp])
        f_g = jax.nn.sigmoid(gates[:, 1 * hp:2 * hp])
        g_g = jnp.tanh(gates[:, 2 * hp:3 * hp])
        o_g = jax.nn.sigmoid(gates[:, 3 * hp:4 * hp])
        c_new = f_g * c_scr[...] + i_g * g_g
        h_new = o_g * jnp.tanh(c_new)
        c_scr[...] = c_new
        h_scr[...] = h_new
        out_ref[s_eff] = h_new
        return carry

    jax.lax.fori_loop(0, t_blk, step, 0, unroll=True)


# ---------------------------------------------------------------------------
# Weight preparation: transpose once, pad each gate channel block to Hp lanes.
# ---------------------------------------------------------------------------
def _pad_gates_t(w, hp):
    """(4H, D) PyTorch gate-major weight -> (D, 4*hp) transposed, gate-padded."""
    four_h, d_in = w.shape
    h = four_h // 4
    wt = w.T.reshape(d_in, 4, h)
    wt = jnp.pad(wt, ((0, 0), (0, 0), (0, hp - h)))
    return wt.reshape(d_in, 4 * hp)


def _pad_gate_bias(b, hp):
    """(1, 4H) combined bias -> (4*hp,) gate-padded."""
    b = b.reshape(4, -1)
    h = b.shape[1]
    return jnp.pad(b, ((0, 0), (0, hp - h))).reshape(4 * hp)


def _pad_whh_t(w, hp):
    """(4H, H) -> (hp, 4*hp) transposed + zero-padded (padded h channels are 0)."""
    h = w.shape[1]
    wt = _pad_gates_t(w, hp)                       # (H, 4*hp)
    return jnp.pad(wt, ((0, hp - h), (0, 0)))


# ---------------------------------------------------------------------------
# One bidirectional LSTM layer on time-major input (T, B, D) -> (T, B, 2H).
# ---------------------------------------------------------------------------
def bilstm_layer(x_tbd, p, *, t_blk=8):
    T, B, D = x_tbd.shape
    H = p["whh_f"].shape[1]
    Hp = _round_up(H, LANE)
    Bp = _round_up(B, SUBLANE)
    Tp = _round_up(T, t_blk)
    n_tb = Tp // t_blk

    # One-time weight transpose / padding (outside the recurrence).
    wih_t = jnp.concatenate([_pad_gates_t(p["wih_f"], Hp),
                             _pad_gates_t(p["wih_b"], Hp)], axis=-1)   # (D, 8*Hp)
    b_cat = jnp.concatenate([_pad_gate_bias(p["b_f"], Hp),
                             _pad_gate_bias(p["b_b"], Hp)])            # (8*Hp,)
    whh_t = jnp.stack([_pad_whh_t(p["whh_f"], Hp),
                       _pad_whh_t(p["whh_b"], Hp)], axis=0)            # (2, Hp, 4*Hp)

    # Hoisted time-parallel input GEMM: both directions in a single big matmul.
    gx = x_tbd.reshape(T * B, D) @ wih_t + b_cat                       # (T*B, 8*Hp)
    gx = gx.reshape(T, B, 8 * Hp).astype(jnp.float32)
    # Zero-pad batch/time. Zero gate pre-activations keep h/c exactly 0 through
    # padded timesteps, so the backward recurrence still sees a zero init state.
    gx = jnp.pad(gx, ((0, Tp - T), (0, Bp - B), (0, 0)))

    def time_map(d, tb):
        # forward: block tb ; backward: block n_tb-1-tb ; lane block = direction
        return (tb + d * (n_tb - 1 - 2 * tb), 0, d)

    out = pl.pallas_call(
        bilstm_recurrence_kernel,
        out_shape=jax.ShapeDtypeStruct((Tp, Bp, 2 * Hp), jnp.float32),
        grid_spec=pltpu.PrefetchScalarGridSpec(
            num_scalar_prefetch=0,
            grid=(2, n_tb),
            in_specs=[
                pl.BlockSpec((t_blk, Bp, 4 * Hp), time_map),
                pl.BlockSpec((1, Hp, 4 * Hp), lambda d, tb: (d, 0, 0)),
            ],
            out_specs=pl.BlockSpec((t_blk, Bp, Hp), time_map),
            scratch_shapes=[
                pltpu.VMEM((Bp, Hp), jnp.float32),   # h carry
                pltpu.VMEM((Bp, Hp), jnp.float32),   # c carry
            ],
        ),
        compiler_params=pltpu.CompilerParams(
            dimension_semantics=("parallel", "arbitrary")),
    )(gx, whh_t)

    out = out[:T, :B]
    if Hp == H:
        return out                                         # already (T, B, 2H)
    # Demo-sized H < 128: strip the per-gate lane padding.
    return jnp.concatenate([out[..., :H], out[..., Hp:Hp + H]], axis=-1)


# ---------------------------------------------------------------------------
# BiLSTMEncoder forward (concat=False, bidir=True, return_last=False,
# input_lengths=None). LockedDropout is identity at inference.
# TODO(synk): LockedDropout training-mode mask not implemented (eval semantics).
# ---------------------------------------------------------------------------
def bilstm_encoder_forward(x_btd, layer_params, *, t_blk=8):
    out = jnp.transpose(x_btd, (1, 0, 2))   # (B,T,D) -> (T,B,D), once per call
    for p in layer_params:
        out = bilstm_layer(out, p, t_blk=t_blk)
    return jnp.transpose(out, (1, 0, 2))    # back to (B, T, 2H)


# ---------------------------------------------------------------------------
# Pure-JAX reference (lax.scan) for correctness checking.
# ---------------------------------------------------------------------------
def _lstm_ref_dir(x_tbd, wih, whh, b, reverse):
    T, B, _ = x_tbd.shape
    H = whh.shape[1]
    xs = x_tbd[::-1] if reverse else x_tbd

    def step(carry, x):
        h, c = carry
        gates = x @ wih.T + h @ whh.T + b
        i = jax.nn.sigmoid(gates[:, 0 * H:1 * H])
        f = jax.nn.sigmoid(gates[:, 1 * H:2 * H])
        g = jnp.tanh(gates[:, 2 * H:3 * H])
        o = jax.nn.sigmoid(gates[:, 3 * H:4 * H])
        c = f * c + i * g
        h = o * jnp.tanh(c)
        return (h, c), h

    init = (jnp.zeros((B, H), jnp.float32), jnp.zeros((B, H), jnp.float32))
    _, hs = jax.lax.scan(step, init, xs)
    return hs[::-1] if reverse else hs


def bilstm_encoder_ref(x_btd, layer_params):
    out = jnp.transpose(x_btd, (1, 0, 2))
    for p in layer_params:
        fwd = _lstm_ref_dir(out, p["wih_f"], p["whh_f"], p["b_f"][0], False)
        bwd = _lstm_ref_dir(out, p["wih_b"], p["whh_b"], p["b_b"][0], True)
        out = jnp.concatenate([fwd, bwd], axis=-1)
    return jnp.transpose(out, (1, 0, 2))


def init_params(key, input_size, num_units, num_layers):
    """Weights ~ N(0, 0.1) (reset_parameters), biases zero, per layer/direction."""
    params = []
    for i in range(num_layers):
        d_in = input_size if i == 0 else 2 * num_units
        key, k1, k2, k3, k4 = jax.random.split(key, 5)
        layer = {
            "wih_f": 0.1 * jax.random.normal(k1, (4 * num_units, d_in), jnp.float32),
            "whh_f": 0.1 * jax.random.normal(k2, (4 * num_units, num_units), jnp.float32),
            "b_f": jnp.zeros((1, 4 * num_units), jnp.float32),
            "wih_b": 0.1 * jax.random.normal(k3, (4 * num_units, d_in), jnp.float32),
            "whh_b": 0.1 * jax.random.normal(k4, (4 * num_units, num_units), jnp.float32),
            "b_b": jnp.zeros((1, 4 * num_units), jnp.float32),
        }
        params.append(layer)
    return params


if __name__ == "__main__":
    B, T = 2, 8
    input_size, num_units, num_layers = 16, 32, 2

    key = jax.random.PRNGKey(0)
    key, xkey = jax.random.split(key)
    x = jax.random.normal(xkey, (B, T, input_size), jnp.float32)

    params = init_params(key, input_size, num_units, num_layers)

    fwd = jax.jit(bilstm_encoder_forward)
    out = jax.block_until_ready(fwd(x, params))
    assert out.shape == (B, T, 2 * num_units), out.shape

    ref = jax.block_until_ready(bilstm_encoder_ref(x, params))
    assert jnp.allclose(out, ref, atol=1e-4, rtol=1e-4), \
        float(jnp.max(jnp.abs(out - ref)))

    print("KERNEL_OK")
</pallas_src>

<mosaic_0001>
module attributes {stable_mosaic.version = 11 : i64} {
  func.func @bilstm_recurrence_kernel(%arg0: i32, %arg1: i32, %arg2: memref<8x8x512xf32, #tpu.memory_space<vmem>>, %arg3: memref<1x128x512xf32, #tpu.memory_space<vmem>>, %arg4: memref<8x8x128xf32, #tpu.memory_space<vmem>>, %arg5: memref<8x128xf32, #tpu.memory_space<vmem>>, %arg6: memref<8x128xf32, #tpu.memory_space<vmem>>) attributes {dimension_semantics = [#tpu.dimension_semantics<parallel>, #tpu.dimension_semantics<arbitrary>], iteration_bounds = array<i64: 2, 1>, scalar_prefetch = 0 : i64, scratch_operands = 2 : i64, tpu.core_type = #tpu.core_type<tc>, window_params = [{transform_indices = @transform_0, window_bounds = array<i64: 8, 8, 512>}, {transform_indices = @transform_1, window_bounds = array<i64: 1, 128, 512>}, {transform_indices = @transform_2, window_bounds = array<i64: 8, 8, 128>}]} {
    %c0_i32 = arith.constant 0 : i32
    %0 = arith.cmpi eq, %arg1, %c0_i32 : i32
    %1 = arith.extui %0 : i1 to i32
    %c0_i32_0 = arith.constant 0 : i32
    %2 = arith.cmpi ne, %1, %c0_i32_0 : i32
    scf.if %2 {
      %cst_147 = arith.constant 0.000000e+00 : f32
      %341 = vector.broadcast %cst_147 : f32 to vector<8x128xf32>
      %c0_148 = arith.constant 0 : index
      %c0_149 = arith.constant 0 : index
      %342 = vector.load %arg5[%c0_148, %c0_149] : memref<8x128xf32, #tpu.memory_space<vmem>>, vector<8x128xf32>
      tpu.vector_store %arg5[%c0_148, %c0_149], %341 {strides = array<i32>} : memref<8x128xf32, #tpu.memory_space<vmem>>, vector<8x128xf32>,
      %cst_150 = arith.constant 0.000000e+00 : f32
      %343 = vector.broadcast %cst_150 : f32 to vector<8x128xf32>
      %c0_151 = arith.constant 0 : index
      %c0_152 = arith.constant 0 : index
      %344 = vector.load %arg6[%c0_151, %c0_152] : memref<8x128xf32, #tpu.memory_space<vmem>>, vector<8x128xf32>
      tpu.vector_store %arg6[%c0_151, %c0_152], %343 {strides = array<i32>} : memref<8x128xf32, #tpu.memory_space<vmem>>, vector<8x128xf32>,
    } else {
    }
    %c0 = arith.constant 0 : index
    %c0_1 = arith.constant 0 : index
    %c0_2 = arith.constant 0 : index
    %3 = vector.load %arg3[%c0, %c0_1, %c0_2] : memref<1x128x512xf32, #tpu.memory_space<vmem>>, vector<1x128x512xf32>
    %4 = vector.shape_cast %3 : vector<1x128x512xf32> to vector<128x512xf32>
    %c0_i32_3 = arith.constant 0 : i32
    %c2_i32 = arith.constant 2 : i32
    %5 = arith.muli %c2_i32, %c0_i32_3 : i32
    %c7_i32 = arith.constant 7 : i32
    %6 = arith.subi %c7_i32, %5 : i32
    %7 = arith.muli %arg0, %6 : i32
    %8 = arith.addi %c0_i32_3, %7 : i32
    %9 = arith.index_cast %8 : i32 to index
    %c0_4 = arith.constant 0 : index
    %c0_5 = arith.constant 0 : index
    %10 = vector.load %arg2[%9, %c0_4, %c0_5] : memref<8x8x512xf32, #tpu.memory_space<vmem>>, vector<1x8x512xf32>
    %11 = vector.shape_cast %10 : vector<1x8x512xf32> to vector<8x512xf32>
    %c0_6 = arith.constant 0 : index
    %c0_7 = arith.constant 0 : index
    %12 = vector.load %arg5[%c0_6, %c0_7] : memref<8x128xf32, #tpu.memory_space<vmem>>, vector<8x128xf32>
    %cst = arith.constant dense<0.000000e+00> : vector<8x512xf32>
    %13 = tpu.matmul %12, %4, %cst {dimension_numbers = #tpu.dot_dimension_numbers<[1], [0], [0], [1], [0, 0, 1, 1], [], []>} : vector<8x128xf32>, vector<128x512xf32>, vector<8x512xf32> -> vector<8x512xf32>
    %14 = arith.addf %11, %13 : vector<8x512xf32>
    %15 = vector.extract_strided_slice %14 {offsets = [0, 0], sizes = [8, 128], strides = [1, 1]} : vector<8x512xf32> to vector<8x128xf32>
    %16 = arith.negf %15 : vector<8x128xf32>
    %17 = math.exp %16 : vector<8x128xf32>
    %cst_8 = arith.constant 1.000000e+00 : f32
    %18 = vector.broadcast %cst_8 : f32 to vector<8x128xf32>
    %19 = arith.addf %18, %17 : vector<8x128xf32>
    %20 = arith.divf %18, %19 : vector<8x128xf32>
    %21 = vector.extract_strided_slice %14 {offsets = [0, 128], sizes = [8, 128], strides = [1, 1]} : vector<8x512xf32> to vector<8x128xf32>
    %22 = arith.negf %21 : vector<8x128xf32>
    %23 = math.exp %22 : vector<8x128xf32>
    %cst_9 = arith.constant 1.000000e+00 : f32
    %24 = vector.broadcast %cst_9 : f32 to vector<8x128xf32>
    %25 = arith.addf %24, %23 : vector<8x128xf32>
    %26 = arith.divf %24, %25 : vector<8x128xf32>
    %27 = vector.extract_strided_slice %14 {offsets = [0, 256], sizes = [8, 128], strides = [1, 1]} : vector<8x512xf32> to vector<8x128xf32>
    %28 = math.tanh %27 : vector<8x128xf32>
    %29 = vector.extract_strided_slice %14 {offsets = [0, 384], sizes = [8, 128], strides = [1, 1]} : vector<8x512xf32> to vector<8x128xf32>
    %30 = arith.negf %29 : vector<8x128xf32>
    %31 = math.exp %30 : vector<8x128xf32>
    %cst_10 = arith.constant 1.000000e+00 : f32
    %32 = vector.broadcast %cst_10 : f32 to vector<8x128xf32>
    %33 = arith.addf %32, %31 : vector<8x128xf32>
    %34 = arith.divf %32, %33 : vector<8x128xf32>
    %c0_11 = arith.constant 0 : index
    %c0_12 = arith.constant 0 : index
    %35 = vector.load %arg6[%c0_11, %c0_12] : memref<8x128xf32, #tpu.memory_space<vmem>>, vector<8x128xf32>
    %36 = arith.mulf %26, %35 : vector<8x128xf32>
    %37 = arith.mulf %20, %28 : vector<8x128xf32>
    %38 = arith.addf %36, %37 : vector<8x128xf32>
    %39 = math.tanh %38 : vector<8x128xf32>
    %40 = arith.mulf %34, %39 : vector<8x128xf32>
    %c0_13 = arith.constant 0 : index
    %c0_14 = arith.constant 0 : index
    %41 = vector.load %arg6[%c0_13, %c0_14] : memref<8x128xf32, #tpu.memory_space<vmem>>, vector<8x128xf32>
    tpu.vector_store %arg6[%c0_13, %c0_14], %38 {strides = array<i32>} : memref<8x128xf32, #tpu.memory_space<vmem>>, vector<8x128xf32>,
    %c0_15 = arith.constant 0 : index
    %c0_16 = arith.constant 0 : index
    %42 = vector.load %arg5[%c0_15, %c0_16] : memref<8x128xf32, #tpu.memory_space<vmem>>, vector<8x128xf32>
    tpu.vector_store %arg5[%c0_15, %c0_16], %40 {strides = array<i32>} : memref<8x128xf32, #tpu.memory_space<vmem>>, vector<8x128xf32>,
    %43 = arith.index_cast %8 : i32 to index
    %c0_17 = arith.constant 0 : index
    %c0_18 = arith.constant 0 : index
    %44 = vector.load %arg4[%43, %c0_17, %c0_18] : memref<8x8x128xf32, #tpu.memory_space<vmem>>, vector<1x8x128xf32>
    %45 = vector.shape_cast %44 : vector<1x8x128xf32> to vector<8x128xf32>
    %46 = vector.shape_cast %40 : vector<8x128xf32> to vector<1x8x128xf32>
    tpu.vector_store %arg4[%43, %c0_17, %c0_18], %46 {strides = array<i32>} : memref<8x8x128xf32, #tpu.memory_space<vmem>>, vector<1x8x128xf32>,
    %c1_i32 = arith.constant 1 : i32
    %c2_i32_19 = arith.constant 2 : i32
    %47 = arith.muli %c2_i32_19, %c1_i32 : i32
    %c7_i32_20 = arith.constant 7 : i32
    %48 = arith.subi %c7_i32_20, %47 : i32
    %49 = arith.muli %arg0, %48 : i32
    %50 = arith.addi %c1_i32, %49 : i32
    %51 = arith.index_cast %50 : i32 to index
    %c0_21 = arith.constant 0 : index
    %c0_22 = arith.constant 0 : index
    %52 = vector.load %arg2[%51, %c0_21, %c0_22] : memref<8x8x512xf32, #tpu.memory_space<vmem>>, vector<1x8x512xf32>
    %53 = vector.shape_cast %52 : vector<1x8x512xf32> to vector<8x512xf32>
    %c0_23 = arith.constant 0 : index
    %c0_24 = arith.constant 0 : index
    %54 = vector.load %arg5[%c0_23, %c0_24] : memref<8x128xf32, #tpu.memory_space<vmem>>, vector<8x128xf32>
    %cst_25 = arith.constant dense<0.000000e+00> : vector<8x512xf32>
    %55 = tpu.matmul %54, %4, %cst_25 {dimension_numbers = #tpu.dot_dimension_numbers<[1], [0], [0], [1], [0, 0, 1, 1], [], []>} : vector<8x128xf32>, vector<128x512xf32>, vector<8x512xf32> -> vector<8x512xf32>
    %56 = arith.addf %53, %55 : vector<8x512xf32>
    %57 = vector.extract_strided_slice %56 {offsets = [0, 0], sizes = [8, 128], strides = [1, 1]} : vector<8x512xf32> to vector<8x128xf32>
    %58 = arith.negf %57 : vector<8x128xf32>
    %59 = math.exp %58 : vector<8x128xf32>
    %cst_26 = arith.constant 1.000000e+00 : f32
    %60 = vector.broadcast %cst_26 : f32 to vector<8x128xf32>
    %61 = arith.addf %60, %59 : vector<8x128xf32>
    %62 = arith.divf %60, %61 : vector<8x128xf32>
    %63 = vector.extract_strided_slice %56 {offsets = [0, 128], sizes = [8, 128], strides = [1, 1]} : vector<8x512xf32> to vector<8x128xf32>
    %64 = arith.negf %63 : vector<8x128xf32>
    %65 = math.exp %64 : vector<8x128xf32>
    %cst_27 = arith.constant 1.000000e+00 : f32
    %66 = vector.broadcast %cst_27 : f32 to vector<8x128xf32>
    %67 = arith.addf %66, %65 : vector<8x128xf32>
    %68 = arith.divf %66, %67 : vector<8x128xf32>
    %69 = vector.extract_strided_slice %56 {offsets = [0, 256], sizes = [8, 128], strides = [1, 1]} : vector<8x512xf32> to vector<8x128xf32>
    %70 = math.tanh %69 : vector<8x128xf32>
    %71 = vector.extract_strided_slice %56 {offsets = [0, 384], sizes = [8, 128], strides = [1, 1]} : vector<8x512xf32> to vector<8x128xf32>
    %72 = arith.negf %71 : vector<8x128xf32>
    %73 = math.exp %72 : vector<8x128xf32>
    %cst_28 = arith.constant 1.000000e+00 : f32
    %74 = vector.broadcast %cst_28 : f32 to vector<8x128xf32>
    %75 = arith.addf %74, %73 : vector<8x128xf32>
    %76 = arith.divf %74, %75 : vector<8x128xf32>
    %c0_29 = arith.constant 0 : index
    %c0_30 = arith.constant 0 : index
    %77 = vector.load %arg6[%c0_29, %c0_30] : memref<8x128xf32, #tpu.memory_space<vmem>>, vector<8x128xf32>
    %78 = arith.mulf %68, %77 : vector<8x128xf32>
    %79 = arith.mulf %62, %70 : vector<8x128xf32>
    %80 = arith.addf %78, %79 : vector<8x128xf32>
    %81 = math.tanh %80 : vector<8x128xf32>
    %82 = arith.mulf %76, %81 : vector<8x128xf32>
    %c0_31 = arith.constant 0 : index
    %c0_32 = arith.constant 0 : index
    %83 = vector.load %arg6[%c0_31, %c0_32] : memref<8x128xf32, #tpu.memory_space<vmem>>, vector<8x128xf32>
    tpu.vector_store %arg6[%c0_31, %c0_32], %80 {strides = array<i32>} : memref<8x128xf32, #tpu.memory_space<vmem>>, vector<8x128xf32>,
    %c0_33 = arith.constant 0 : index
    %c0_34 = arith.constant 0 : index
    %84 = vector.load %arg5[%c0_33, %c0_34] : memref<8x128xf32, #tpu.memory_space<vmem>>, vector<8x128xf32>
    tpu.vector_store %arg5[%c0_33, %c0_34], %82 {strides = array<i32>} : memref<8x128xf32, #tpu.memory_space<vmem>>, vector<8x128xf32>,
    %85 = arith.index_cast %50 : i32 to index
    %c0_35 = arith.constant 0 : index
    %c0_36 = arith.constant 0 : index
    %86 = vector.load %arg4[%85, %c0_35, %c0_36] : memref<8x8x128xf32, #tpu.memory_space<vmem>>, vector<1x8x128xf32>
    %87 = vector.shape_cast %86 : vector<1x8x128xf32> to vector<8x128xf32>
    %88 = vector.shape_cast %82 : vector<8x128xf32> to vector<1x8x128xf32>
    tpu.vector_store %arg4[%85, %c0_35, %c0_36], %88 {strides = array<i32>} : memref<8x8x128xf32, #tpu.memory_space<vmem>>, vector<1x8x128xf32>,
    %c2_i32_37 = arith.constant 2 : i32
    %c2_i32_38 = arith.constant 2 : i32
    %89 = arith.muli %c2_i32_38, %c2_i32_37 : i32
    %c7_i32_39 = arith.constant 7 : i32
    %90 = arith.subi %c7_i32_39, %89 : i32
    %91 = arith.muli %arg0, %90 : i32
    %92 = arith.addi %c2_i32_37, %91 : i32
    %93 = arith.index_cast %92 : i32 to index
    %c0_40 = arith.constant 0 : index
    %c0_41 = arith.constant 0 : index
    %94 = vector.load %arg2[%93, %c0_40, %c0_41] : memref<8x8x512xf32, #tpu.memory_space<vmem>>, vector<1x8x512xf32>
    %95 = vector.shape_cast %94 : vector<1x8x512xf32> to vector<8x512xf32>
    %c0_42 = arith.constant 0 : index
    %c0_43 = arith.constant 0 : index
    %96 = vector.load %arg5[%c0_42, %c0_43] : memref<8x128xf32, #tpu.memory_space<vmem>>, vector<8x128xf32>
    %cst_44 = arith.constant dense<0.000000e+00> : vector<8x512xf32>
    %97 = tpu.matmul %96, %4, %cst_44 {dimension_numbers = #tpu.dot_dimension_numbers<[1], [0], [0], [1], [0, 0, 1, 1], [], []>} : vector<8x128xf32>, vector<128x512xf32>, vector<8x512xf32> -> vector<8x512xf32>
    %98 = arith.addf %95, %97 : vector<8x512xf32>
    %99 = vector.extract_strided_slice %98 {offsets = [0, 0], sizes = [8, 128], strides = [1, 1]} : vector<8x512xf32> to vector<8x128xf32>
    %100 = arith.negf %99 : vector<8x128xf32>
    %101 = math.exp %100 : vector<8x128xf32>
    %cst_45 = arith.constant 1.000000e+00 : f32
    %102 = vector.broadcast %cst_45 : f32 to vector<8x128xf32>
    %103 = arith.addf %102, %101 : vector<8x128xf32>
    %104 = arith.divf %102, %103 : vector<8x128xf32>
    %105 = vector.extract_strided_slice %98 {offsets = [0, 128], sizes = [8, 128], strides = [1, 1]} : vector<8x512xf32> to vector<8x128xf32>
    %106 = arith.negf %105 : vector<8x128xf32>
    %107 = math.exp %106 : vector<8x128xf32>
    %cst_46 = arith.constant 1.000000e+00 : f32
    %108 = vector.broadcast %cst_46 : f32 to vector<8x128xf32>
    %109 = arith.addf %108, %107 : vector<8x128xf32>
    %110 = arith.divf %108, %109 : vector<8x128xf32>
    %111 = vector.extract_strided_slice %98 {offsets = [0, 256], sizes = [8, 128], strides = [1, 1]} : vector<8x512xf32> to vector<8x128xf32>
    %112 = math.tanh %111 : vector<8x128xf32>
    %113 = vector.extract_strided_slice %98 {offsets = [0, 384], sizes = [8, 128], strides = [1, 1]} : vector<8x512xf32> to vector<8x128xf32>
    %114 = arith.negf %113 : vector<8x128xf32>
    %115 = math.exp %114 : vector<8x128xf32>
    %cst_47 = arith.constant 1.000000e+00 : f32
    %116 = vector.broadcast %cst_47 : f32 to vector<8x128xf32>
    %117 = arith.addf %116, %115 : vector<8x128xf32>
    %118 = arith.divf %116, %117 : vector<8x128xf32>
    %c0_48 = arith.constant 0 : index
    %c0_49 = arith.constant 0 : index
    %119 = vector.load %arg6[%c0_48, %c0_49] : memref<8x128xf32, #tpu.memory_space<vmem>>, vector<8x128xf32>
    %120 = arith.mulf %110, %119 : vector<8x128xf32>
    %121 = arith.mulf %104, %112 : vector<8x128xf32>
    %122 = arith.addf %120, %121 : vector<8x128xf32>
    %123 = math.tanh %122 : vector<8x128xf32>
    %124 = arith.mulf %118, %123 : vector<8x128xf32>
    %c0_50 = arith.constant 0 : index
    %c0_51 = arith.constant 0 : index
    %125 = vector.load %arg6[%c0_50, %c0_51] : memref<8x128xf32, #tpu.memory_space<vmem>>, vector<8x128xf32>
    tpu.vector_store %arg6[%c0_50, %c0_51], %122 {strides = array<i32>} : memref<8x128xf32, #tpu.memory_space<vmem>>, vector<8x128xf32>,
    %c0_52 = arith.constant 0 : index
    %c0_53 = arith.constant 0 : index
    %126 = vector.load %arg5[%c0_52, %c0_53] : memref<8x128xf32, #tpu.memory_space<vmem>>, vector<8x128xf32>
    tpu.vector_store %arg5[%c0_52, %c0_53], %124 {strides = array<i32>} : memref<8x128xf32, #tpu.memory_space<vmem>>, vector<8x128xf32>,
    %127 = arith.index_cast %92 : i32 to index
    %c0_54 = arith.constant 0 : index
    %c0_55 = arith.constant 0 : index
    %128 = vector.load %arg4[%127, %c0_54, %c0_55] : memref<8x8x128xf32, #tpu.memory_space<vmem>>, vector<1x8x128xf32>
    %129 = vector.shape_cast %128 : vector<1x8x128xf32> to vector<8x128xf32>
    %130 = vector.shape_cast %124 : vector<8x128xf32> to vector<1x8x128xf32>
    tpu.vector_store %arg4[%127, %c0_54, %c0_55], %130 {strides = array<i32>} : memref<8x8x128xf32, #tpu.memory_space<vmem>>, vector<1x8x128xf32>,
    %c3_i32 = arith.constant 3 : i32
    %c2_i32_56 = arith.constant 2 : i32
    %131 = arith.muli %c2_i32_56, %c3_i32 : i32
    %c7_i32_57 = arith.constant 7 : i32
    %132 = arith.subi %c7_i32_57, %131 : i32
    %133 = arith.muli %arg0, %132 : i32
    %134 = arith.addi %c3_i32, %133 : i32
    %135 = arith.index_cast %134 : i32 to index
    %c0_58 = arith.constant 0 : index
    %c0_59 = arith.constant 0 : index
    %136 = vector.load %arg2[%135, %c0_58, %c0_59] : memref<8x8x512xf32, #tpu.memory_space<vmem>>, vector<1x8x512xf32>
    %137 = vector.shape_cast %136 : vector<1x8x512xf32> to vector<8x512xf32>
    %c0_60 = arith.constant 0 : index
    %c0_61 = arith.constant 0 : index
    %138 = vector.load %arg5[%c0_60, %c0_61] : memref<8x128xf32, #tpu.memory_space<vmem>>, vector<8x128xf32>
    %cst_62 = arith.constant dense<0.000000e+00> : vector<8x512xf32>
    %139 = tpu.matmul %138, %4, %cst_62 {dimension_numbers = #tpu.dot_dimension_numbers<[1], [0], [0], [1], [0, 0, 1, 1], [], []>} : vector<8x128xf32>, vector<128x512xf32>, vector<8x512xf32> -> vector<8x512xf32>
    %140 = arith.addf %137, %139 : vector<8x512xf32>
    %141 = vector.extract_strided_slice %140 {offsets = [0, 0], sizes = [8, 128], strides = [1, 1]} : vector<8x512xf32> to vector<8x128xf32>
    %142 = arith.negf %141 : vector<8x128xf32>
    %143 = math.exp %142 : vector<8x128xf32>
    %cst_63 = arith.constant 1.000000e+00 : f32
    %144 = vector.broadcast %cst_63 : f32 to vector<8x128xf32>
    %145 = arith.addf %144, %143 : vector<8x128xf32>
    %146 = arith.divf %144, %145 : vector<8x128xf32>
    %147 = vector.extract_strided_slice %140 {offsets = [0, 128], sizes = [8, 128], strides = [1, 1]} : vector<8x512xf32> to vector<8x128xf32>
    %148 = arith.negf %147 : vector<8x128xf32>
    %149 = math.exp %148 : vector<8x128xf32>
    %cst_64 = arith.constant 1.000000e+00 : f32
    %150 = vector.broadcast %cst_64 : f32 to vector<8x128xf32>
    %151 = arith.addf %150, %149 : vector<8x128xf32>
    %152 = arith.divf %150, %151 : vector<8x128xf32>
    %153 = vector.extract_strided_slice %140 {offsets = [0, 256], sizes = [8, 128], strides = [1, 1]} : vector<8x512xf32> to vector<8x128xf32>
    %154 = math.tanh %153 : vector<8x128xf32>
    %155 = vector.extract_strided_slice %140 {offsets = [0, 384], sizes = [8, 128], strides = [1, 1]} : vector<8x512xf32> to vector<8x128xf32>
    %156 = arith.negf %155 : vector<8x128xf32>
    %157 = math.exp %156 : vector<8x128xf32>
    %cst_65 = arith.constant 1.000000e+00 : f32
    %158 = vector.broadcast %cst_65 : f32 to vector<8x128xf32>
    %159 = arith.addf %158, %157 : vector<8x128xf32>
    %160 = arith.divf %158, %159 : vector<8x128xf32>
    %c0_66 = arith.constant 0 : index
    %c0_67 = arith.constant 0 : index
    %161 = vector.load %arg6[%c0_66, %c0_67] : memref<8x128xf32, #tpu.memory_space<vmem>>, vector<8x128xf32>
    %162 = arith.mulf %152, %161 : vector<8x128xf32>
    %163 = arith.mulf %146, %154 : vector<8x128xf32>
    %164 = arith.addf %162, %163 : vector<8x128xf32>
    %165 = math.tanh %164 : vector<8x128xf32>
    %166 = arith.mulf %160, %165 : vector<8x128xf32>
    %c0_68 = arith.constant 0 : index
    %c0_69 = arith.constant 0 : index
    %167 = vector.load %arg6[%c0_68, %c0_69] : memref<8x128xf32, #tpu.memory_space<vmem>>, vector<8x128xf32>
    tpu.vector_store %arg6[%c0_68, %c0_69], %164 {strides = array<i32>} : memref<8x128xf32, #tpu.memory_space<vmem>>, vector<8x128xf32>,
    %c0_70 = arith.constant 0 : index
    %c0_71 = arith.constant 0 : index
    %168 = vector.load %arg5[%c0_70, %c0_71] : memref<8x128xf32, #tpu.memory_space<vmem>>, vector<8x128xf32>
    tpu.vector_store %arg5[%c0_70, %c0_71], %166 {strides = array<i32>} : memref<8x128xf32, #tpu.memory_space<vmem>>, vector<8x128xf32>,
    %169 = arith.index_cast %134 : i32 to index
    %c0_72 = arith.constant 0 : index
    %c0_73 = arith.constant 0 : index
    %170 = vector.load %arg4[%169, %c0_72, %c0_73] : memref<8x8x128xf32, #tpu.memory_space<vmem>>, vector<1x8x128xf32>
    %171 = vector.shape_cast %170 : vector<1x8x128xf32> to vector<8x128xf32>
    %172 = vector.shape_cast %166 : vector<8x128xf32> to vector<1x8x128xf32>
    tpu.vector_store %arg4[%169, %c0_72, %c0_73], %172 {strides = array<i32>} : memref<8x8x128xf32, #tpu.memory_space<vmem>>, vector<1x8x128xf32>,
    %c4_i32 = arith.constant 4 : i32
    %c2_i32_74 = arith.constant 2 : i32
    %173 = arith.muli %c2_i32_74, %c4_i32 : i32
    %c7_i32_75 = arith.constant 7 : i32
    %174 = arith.subi %c7_i32_75, %173 : i32
    %175 = arith.muli %arg0, %174 : i32
    %176 = arith.addi %c4_i32, %175 : i32
    %177 = arith.index_cast %176 : i32 to index
    %c0_76 = arith.constant 0 : index
    %c0_77 = arith.constant 0 : index
    %178 = vector.load %arg2[%177, %c0_76, %c0_77] : memref<8x8x512xf32, #tpu.memory_space<vmem>>, vector<1x8x512xf32>
    %179 = vector.shape_cast %178 : vector<1x8x512xf32> to vector<8x512xf32>
    %c0_78 = arith.constant 0 : index
    %c0_79 = arith.constant 0 : index
    %180 = vector.load %arg5[%c0_78, %c0_79] : memref<8x128xf32, #tpu.memory_space<vmem>>, vector<8x128xf32>
    %cst_80 = arith.constant dense<0.000000e+00> : vector<8x512xf32>
    %181 = tpu.matmul %180, %4, %cst_80 {dimension_numbers = #tpu.dot_dimension_numbers<[1], [0], [0], [1], [0, 0, 1, 1], [], []>} : vector<8x128xf32>, vector<128x512xf32>, vector<8x512xf32> -> vector<8x512xf32>
    %182 = arith.addf %179, %181 : vector<8x512xf32>
    %183 = vector.extract_strided_slice %182 {offsets = [0, 0], sizes = [8, 128], strides = [1, 1]} : vector<8x512xf32> to vector<8x128xf32>
    %184 = arith.negf %183 : vector<8x128xf32>
    %185 = math.exp %184 : vector<8x128xf32>
    %cst_81 = arith.constant 1.000000e+00 : f32
    %186 = vector.broadcast %cst_81 : f32 to vector<8x128xf32>
    %187 = arith.addf %186, %185 : vector<8x128xf32>
    %188 = arith.divf %186, %187 : vector<8x128xf32>
    %189 = vector.extract_strided_slice %182 {offsets = [0, 128], sizes = [8, 128], strides = [1, 1]} : vector<8x512xf32> to vector<8x128xf32>
    %190 = arith.negf %189 : vector<8x128xf32>
    %191 = math.exp %190 : vector<8x128xf32>
    %cst_82 = arith.constant 1.000000e+00 : f32
    %192 = vector.broadcast %cst_82 : f32 to vector<8x128xf32>
    %193 = arith.addf %192, %191 : vector<8x128xf32>
    %194 = arith.divf %192, %193 : vector<8x128xf32>
    %195 = vector.extract_strided_slice %182 {offsets = [0, 256], sizes = [8, 128], strides = [1, 1]} : vector<8x512xf32> to vector<8x128xf32>
    %196 = math.tanh %195 : vector<8x128xf32>
    %197 = vector.extract_strided_slice %182 {offsets = [0, 384], sizes = [8, 128], strides = [1, 1]} : vector<8x512xf32> to vector<8x128xf32>
    %198 = arith.negf %197 : vector<8x128xf32>
    %199 = math.exp %198 : vector<8x128xf32>
    %cst_83 = arith.constant 1.000000e+00 : f32
    %200 = vector.broadcast %cst_83 : f32 to vector<8x128xf32>
    %201 = arith.addf %200, %199 : vector<8x128xf32>
    %202 = arith.divf %200, %201 : vector<8x128xf32>
    %c0_84 = arith.constant 0 : index
    %c0_85 = arith.constant 0 : index
    %203 = vector.load %arg6[%c0_84, %c0_85] : memref<8x128xf32, #tpu.memory_space<vmem>>, vector<8x128xf32>
    %204 = arith.mulf %194, %203 : vector<8x128xf32>
    %205 = arith.mulf %188, %196 : vector<8x128xf32>
    %206 = arith.addf %204, %205 : vector<8x128xf32>
    %207 = math.tanh %206 : vector<8x128xf32>
    %208 = arith.mulf %202, %207 : vector<8x128xf32>
    %c0_86 = arith.constant 0 : index
    %c0_87 = arith.constant 0 : index
    %209 = vector.load %arg6[%c0_86, %c0_87] : memref<8x128xf32, #tpu.memory_space<vmem>>, vector<8x128xf32>
    tpu.vector_store %arg6[%c0_86, %c0_87], %206 {strides = array<i32>} : memref<8x128xf32, #tpu.memory_space<vmem>>, vector<8x128xf32>,
    %c0_88 = arith.constant 0 : index
    %c0_89 = arith.constant 0 : index
    %210 = vector.load %arg5[%c0_88, %c0_89] : memref<8x128xf32, #tpu.memory_space<vmem>>, vector<8x128xf32>
    tpu.vector_store %arg5[%c0_88, %c0_89], %208 {strides = array<i32>} : memref<8x128xf32, #tpu.memory_space<vmem>>, vector<8x128xf32>,
    %211 = arith.index_cast %176 : i32 to index
    %c0_90 = arith.constant 0 : index
    %c0_91 = arith.constant 0 : index
    %212 = vector.load %arg4[%211, %c0_90, %c0_91] : memref<8x8x128xf32, #tpu.memory_space<vmem>>, vector<1x8x128xf32>
    %213 = vector.shape_cast %212 : vector<1x8x128xf32> to vector<8x128xf32>
    %214 = vector.shape_cast %208 : vector<8x128xf32> to vector<1x8x128xf32>
    tpu.vector_store %arg4[%211, %c0_90, %c0_91], %214 {strides = array<i32>} : memref<8x8x128xf32, #tpu.memory_space<vmem>>, vector<1x8x128xf32>,
    %c5_i32 = arith.constant 5 : i32
    %c2_i32_92 = arith.constant 2 : i32
    %215 = arith.muli %c2_i32_92, %c5_i32 : i32
    %c7_i32_93 = arith.constant 7 : i32
    %216 = arith.subi %c7_i32_93, %215 : i32
    %217 = arith.muli %arg0, %216 : i32
    %218 = arith.addi %c5_i32, %217 : i32
    %219 = arith.index_cast %218 : i32 to index
    %c0_94 = arith.constant 0 : index
    %c0_95 = arith.constant 0 : index
    %220 = vector.load %arg2[%219, %c0_94, %c0_95] : memref<8x8x512xf32, #tpu.memory_space<vmem>>, vector<1x8x512xf32>
    %221 = vector.shape_cast %220 : vector<1x8x512xf32> to vector<8x512xf32>
    %c0_96 = arith.constant 0 : index
    %c0_97 = arith.constant 0 : index
    %222 = vector.load %arg5[%c0_96, %c0_97] : memref<8x128xf32, #tpu.memory_space<vmem>>, vector<8x128xf32>
    %cst_98 = arith.constant dense<0.000000e+00> : vector<8x512xf32>
    %223 = tpu.matmul %222, %4, %cst_98 {dimension_numbers = #tpu.dot_dimension_numbers<[1], [0], [0], [1], [0, 0, 1, 1], [], []>} : vector<8x128xf32>, vector<128x512xf32>, vector<8x512xf32> -> vector<8x512xf32>
    %224 = arith.addf %221, %223 : vector<8x512xf32>
    %225 = vector.extract_strided_slice %224 {offsets = [0, 0], sizes = [8, 128], strides = [1, 1]} : vector<8x512xf32> to vector<8x128xf32>
    %226 = arith.negf %225 : vector<8x128xf32>
    %227 = math.exp %226 : vector<8x128xf32>
    %cst_99 = arith.constant 1.000000e+00 : f32
    %228 = vector.broadcast %cst_99 : f32 to vector<8x128xf32>
    %229 = arith.addf %228, %227 : vector<8x128xf32>
    %230 = arith.divf %228, %229 : vector<8x128xf32>
    %231 = vector.extract_strided_slice %224 {offsets = [0, 128], sizes = [8, 128], strides = [1, 1]} : vector<8x512xf32> to vector<8x128xf32>
    %232 = arith.negf %231 : vector<8x128xf32>
    %233 = math.exp %232 : vector<8x128xf32>
    %cst_100 = arith.constant 1.000000e+00 : f32
    %234 = vector.broadcast %cst_100 : f32 to vector<8x128xf32>
    %235 = arith.addf %234, %233 : vector<8x128xf32>
    %236 = arith.divf %234, %235 : vector<8x128xf32>
    %237 = vector.extract_strided_slice %224 {offsets = [0, 256], sizes = [8, 128], strides = [1, 1]} : vector<8x512xf32> to vector<8x128xf32>
    %238 = math.tanh %237 : vector<8x128xf32>
    %239 = vector.extract_strided_slice %224 {offsets = [0, 384], sizes = [8, 128], strides = [1, 1]} : vector<8x512xf32> to vector<8x128xf32>
    %240 = arith.negf %239 : vector<8x128xf32>
    %241 = math.exp %240 : vector<8x128xf32>
    %cst_101 = arith.constant 1.000000e+00 : f32
    %242 = vector.broadcast %cst_101 : f32 to vector<8x128xf32>
    %243 = arith.addf %242, %241 : vector<8x128xf32>
    %244 = arith.divf %242, %243 : vector<8x128xf32>
    %c0_102 = arith.constant 0 : index
    %c0_103 = arith.constant 0 : index
    %245 = vector.load %arg6[%c0_102, %c0_103] : memref<8x128xf32, #tpu.memory_space<vmem>>, vector<8x128xf32>
    %246 = arith.mulf %236, %245 : vector<8x128xf32>
    %247 = arith.mulf %230, %238 : vector<8x128xf32>
    %248 = arith.addf %246, %247 : vector<8x128xf32>
    %249 = math.tanh %248 : vector<8x128xf32>
    %250 = arith.mulf %244, %249 : vector<8x128xf32>
    %c0_104 = arith.constant 0 : index
    %c0_105 = arith.constant 0 : index
    %251 = vector.load %arg6[%c0_104, %c0_105] : memref<8x128xf32, #tpu.memory_space<vmem>>, vector<8x128xf32>
    tpu.vector_store %arg6[%c0_104, %c0_105], %248 {strides = array<i32>} : memref<8x128xf32, #tpu.memory_space<vmem>>, vector<8x128xf32>,
    %c0_106 = arith.constant 0 : index
    %c0_107 = arith.constant 0 : index
    %252 = vector.load %arg5[%c0_106, %c0_107] : memref<8x128xf32, #tpu.memory_space<vmem>>, vector<8x128xf32>
    tpu.vector_store %arg5[%c0_106, %c0_107], %250 {strides = array<i32>} : memref<8x128xf32, #tpu.memory_space<vmem>>, vector<8x128xf32>,
    %253 = arith.index_cast %218 : i32 to index
    %c0_108 = arith.constant 0 : index
    %c0_109 = arith.constant 0 : index
    %254 = vector.load %arg4[%253, %c0_108, %c0_109] : memref<8x8x128xf32, #tpu.memory_space<vmem>>, vector<1x8x128xf32>
    %255 = vector.shape_cast %254 : vector<1x8x128xf32> to vector<8x128xf32>
    %256 = vector.shape_cast %250 : vector<8x128xf32> to vector<1x8x128xf32>
    tpu.vector_store %arg4[%253, %c0_108, %c0_109], %256 {strides = array<i32>} : memref<8x8x128xf32, #tpu.memory_space<vmem>>, vector<1x8x128xf32>,
    %c6_i32 = arith.constant 6 : i32
    %c2_i32_110 = arith.constant 2 : i32
    %257 = arith.muli %c2_i32_110, %c6_i32 : i32
    %c7_i32_111 = arith.constant 7 : i32
    %258 = arith.subi %c7_i32_111, %257 : i32
    %259 = arith.muli %arg0, %258 : i32
    %260 = arith.addi %c6_i32, %259 : i32
    %261 = arith.index_cast %260 : i32 to index
    %c0_112 = arith.constant 0 : index
    %c0_113 = arith.constant 0 : index
    %262 = vector.load %arg2[%261, %c0_112, %c0_113] : memref<8x8x512xf32, #tpu.memory_space<vmem>>, vector<1x8x512xf32>
    %263 = vector.shape_cast %262 : vector<1x8x512xf32> to vector<8x512xf32>
    %c0_114 = arith.constant 0 : index
    %c0_115 = arith.constant 0 : index
    %264 = vector.load %arg5[%c0_114, %c0_115] : memref<8x128xf32, #tpu.memory_space<vmem>>, vector<8x128xf32>
    %cst_116 = arith.constant dense<0.000000e+00> : vector<8x512xf32>
    %265 = tpu.matmul %264, %4, %cst_116 {dimension_numbers = #tpu.dot_dimension_numbers<[1], [0], [0], [1], [0, 0, 1, 1], [], []>} : vector<8x128xf32>, vector<128x512xf32>, vector<8x512xf32> -> vector<8x512xf32>
    %266 = arith.addf %263, %265 : vector<8x512xf32>
    %267 = vector.extract_strided_slice %266 {offsets = [0, 0], sizes = [8, 128], strides = [1, 1]} : vector<8x512xf32> to vector<8x128xf32>
    %268 = arith.negf %267 : vector<8x128xf32>
    %269 = math.exp %268 : vector<8x128xf32>
    %cst_117 = arith.constant 1.000000e+00 : f32
    %270 = vector.broadcast %cst_117 : f32 to vector<8x128xf32>
    %271 = arith.addf %270, %269 : vector<8x128xf32>
    %272 = arith.divf %270, %271 : vector<8x128xf32>
    %273 = vector.extract_strided_slice %266 {offsets = [0, 128], sizes = [8, 128], strides = [1, 1]} : vector<8x512xf32> to vector<8x128xf32>
    %274 = arith.negf %273 : vector<8x128xf32>
    %275 = math.exp %274 : vector<8x128xf32>
    %cst_118 = arith.constant 1.000000e+00 : f32
    %276 = vector.broadcast %cst_118 : f32 to vector<8x128xf32>
    %277 = arith.addf %276, %275 : vector<8x128xf32>
    %278 = arith.divf %276, %277 : vector<8x128xf32>
    %279 = vector.extract_strided_slice %266 {offsets = [0, 256], sizes = [8, 128], strides = [1, 1]} : vector<8x512xf32> to vector<8x128xf32>
    %280 = math.tanh %279 : vector<8x128xf32>
    %281 = vector.extract_strided_slice %266 {offsets = [0, 384], sizes = [8, 128], strides = [1, 1]} : vector<8x512xf32> to vector<8x128xf32>
    %282 = arith.negf %281 : vector<8x128xf32>
    %283 = math.exp %282 : vector<8x128xf32>
    %cst_119 = arith.constant 1.000000e+00 : f32
    %284 = vector.broadcast %cst_119 : f32 to vector<8x128xf32>
    %285 = arith.addf %284, %283 : vector<8x128xf32>
    %286 = arith.divf %284, %285 : vector<8x128xf32>
    %c0_120 = arith.constant 0 : index
    %c0_121 = arith.constant 0 : index
    %287 = vector.load %arg6[%c0_120, %c0_121] : memref<8x128xf32, #tpu.memory_space<vmem>>, vector<8x128xf32>
    %288 = arith.mulf %278, %287 : vector<8x128xf32>
    %289 = arith.mulf %272, %280 : vector<8x128xf32>
    %290 = arith.addf %288, %289 : vector<8x128xf32>
    %291 = math.tanh %290 : vector<8x128xf32>
    %292 = arith.mulf %286, %291 : vector<8x128xf32>
    %c0_122 = arith.constant 0 : index
    %c0_123 = arith.constant 0 : index
    %293 = vector.load %arg6[%c0_122, %c0_123] : memref<8x128xf32, #tpu.memory_space<vmem>>, vector<8x128xf32>
    tpu.vector_store %arg6[%c0_122, %c0_123], %290 {strides = array<i32>} : memref<8x128xf32, #tpu.memory_space<vmem>>, vector<8x128xf32>,
    %c0_124 = arith.constant 0 : index
    %c0_125 = arith.constant 0 : index
    %294 = vector.load %arg5[%c0_124, %c0_125] : memref<8x128xf32, #tpu.memory_space<vmem>>, vector<8x128xf32>
    tpu.vector_store %arg5[%c0_124, %c0_125], %292 {strides = array<i32>} : memref<8x128xf32, #tpu.memory_space<vmem>>, vector<8x128xf32>,
    %295 = arith.index_cast %260 : i32 to index
    %c0_126 = arith.constant 0 : index
    %c0_127 = arith.constant 0 : index
    %296 = vector.load %arg4[%295, %c0_126, %c0_127] : memref<8x8x128xf32, #tpu.memory_space<vmem>>, vector<1x8x128xf32>
    %297 = vector.shape_cast %296 : vector<1x8x128xf32> to vector<8x128xf32>
    %298 = vector.shape_cast %292 : vector<8x128xf32> to vector<1x8x128xf32>
    tpu.vector_store %arg4[%295, %c0_126, %c0_127], %298 {strides = array<i32>} : memref<8x8x128xf32, #tpu.memory_space<vmem>>, vector<1x8x128xf32>,
    %c7_i32_128 = arith.constant 7 : i32
    %c2_i32_129 = arith.constant 2 : i32
    %299 = arith.muli %c2_i32_129, %c7_i32_128 : i32
    %c7_i32_130 = arith.constant 7 : i32
    %300 = arith.subi %c7_i32_130, %299 : i32
    %301 = arith.muli %arg0, %300 : i32
    %302 = arith.addi %c7_i32_128, %301 : i32
    %303 = arith.index_cast %302 : i32 to index
    %c0_131 = arith.constant 0 : index
    %c0_132 = arith.constant 0 : index
    %304 = vector.load %arg2[%303, %c0_131, %c0_132] : memref<8x8x512xf32, #tpu.memory_space<vmem>>, vector<1x8x512xf32>
    %305 = vector.shape_cast %304 : vector<1x8x512xf32> to vector<8x512xf32>
    %c0_133 = arith.constant 0 : index
    %c0_134 = arith.constant 0 : index
    %306 = vector.load %arg5[%c0_133, %c0_134] : memref<8x128xf32, #tpu.memory_space<vmem>>, vector<8x128xf32>
    %cst_135 = arith.constant dense<0.000000e+00> : vector<8x512xf32>
    %307 = tpu.matmul %306, %4, %cst_135 {dimension_numbers = #tpu.dot_dimension_numbers<[1], [0], [0], [1], [0, 0, 1, 1], [], []>} : vector<8x128xf32>, vector<128x512xf32>, vector<8x512xf32> -> vector<8x512xf32>
    %308 = arith.addf %305, %307 : vector<8x512xf32>
    %309 = vector.extract_strided_slice %308 {offsets = [0, 0], sizes = [8, 128], strides = [1, 1]} : vector<8x512xf32> to vector<8x128xf32>
    %310 = arith.negf %309 : vector<8x128xf32>
    %311 = math.exp %310 : vector<8x128xf32>
    %cst_136 = arith.constant 1.000000e+00 : f32
    %312 = vector.broadcast %cst_136 : f32 to vector<8x128xf32>
    %313 = arith.addf %312, %311 : vector<8x128xf32>
    %314 = arith.divf %312, %313 : vector<8x128xf32>
    %315 = vector.extract_strided_slice %308 {offsets = [0, 128], sizes = [8, 128], strides = [1, 1]} : vector<8x512xf32> to vector<8x128xf32>
    %316 = arith.negf %315 : vector<8x128xf32>
    %317 = math.exp %316 : vector<8x128xf32>
    %cst_137 = arith.constant 1.000000e+00 : f32
    %318 = vector.broadcast %cst_137 : f32 to vector<8x128xf32>
    %319 = arith.addf %318, %317 : vector<8x128xf32>
    %320 = arith.divf %318, %319 : vector<8x128xf32>
    %321 = vector.extract_strided_slice %308 {offsets = [0, 256], sizes = [8, 128], strides = [1, 1]} : vector<8x512xf32> to vector<8x128xf32>
    %322 = math.tanh %321 : vector<8x128xf32>
    %323 = vector.extract_strided_slice %308 {offsets = [0, 384], sizes = [8, 128], strides = [1, 1]} : vector<8x512xf32> to vector<8x128xf32>
    %324 = arith.negf %323 : vector<8x128xf32>
    %325 = math.exp %324 : vector<8x128xf32>
    %cst_138 = arith.constant 1.000000e+00 : f32
    %326 = vector.broadcast %cst_138 : f32 to vector<8x128xf32>
    %327 = arith.addf %326, %325 : vector<8x128xf32>
    %328 = arith.divf %326, %327 : vector<8x128xf32>
    %c0_139 = arith.constant 0 : index
    %c0_140 = arith.constant 0 : index
    %329 = vector.load %arg6[%c0_139, %c0_140] : memref<8x128xf32, #tpu.memory_space<vmem>>, vector<8x128xf32>
    %330 = arith.mulf %320, %329 : vector<8x128xf32>
    %331 = arith.mulf %314, %322 : vector<8x128xf32>
    %332 = arith.addf %330, %331 : vector<8x128xf32>
    %333 = math.tanh %332 : vector<8x128xf32>
    %334 = arith.mulf %328, %333 : vector<8x128xf32>
    %c0_141 = arith.constant 0 : index
    %c0_142 = arith.constant 0 : index
    %335 = vector.load %arg6[%c0_141, %c0_142] : memref<8x128xf32, #tpu.memory_space<vmem>>, vector<8x128xf32>
    tpu.vector_store %arg6[%c0_141, %c0_142], %332 {strides = array<i32>} : memref<8x128xf32, #tpu.memory_space<vmem>>, vector<8x128xf32>,
    %c0_143 = arith.constant 0 : index
    %c0_144 = arith.constant 0 : index
    %336 = vector.load %arg5[%c0_143, %c0_144] : memref<8x128xf32, #tpu.memory_space<vmem>>, vector<8x128xf32>
    tpu.vector_store %arg5[%c0_143, %c0_144], %334 {strides = array<i32>} : memref<8x128xf32, #tpu.memory_space<vmem>>, vector<8x128xf32>,
    %337 = arith.index_cast %302 : i32 to index
    %c0_145 = arith.constant 0 : index
    %c0_146 = arith.constant 0 : index
    %338 = vector.load %arg4[%337, %c0_145, %c0_146] : memref<8x8x128xf32, #tpu.memory_space<vmem>>, vector<1x8x128xf32>
    %339 = vector.shape_cast %338 : vector<1x8x128xf32> to vector<8x128xf32>
    %340 = vector.shape_cast %334 : vector<8x128xf32> to vector<1x8x128xf32>
    tpu.vector_store %arg4[%337, %c0_145, %c0_146], %340 {strides = array<i32>} : memref<8x8x128xf32, #tpu.memory_space<vmem>>, vector<1x8x128xf32>,
    %c8_i32 = arith.constant 8 : i32
    return
  }
  func.func @transform_0(%arg0: i32, %arg1: i32) -> (i32, i32, i32) {
    %c2_i32 = arith.constant 2 : i32
    %0 = arith.muli %c2_i32, %arg1 : i32
    %c0_i32 = arith.constant 0 : i32
    %1 = arith.subi %c0_i32, %0 : i32
    %2 = arith.muli %arg0, %1 : i32
    %3 = arith.addi %arg1, %2 : i32
    %c0_i32_0 = arith.constant 0 : i32
    %c0_i32_1 = arith.constant 0 : i32
    return %3, %c0_i32_0, %arg0 : i32, i32, i32
  }
  func.func @transform_1(%arg0: i32, %arg1: i32) -> (i32, i32, i32) {
    %c0_i32 = arith.constant 0 : i32
    %c0_i32_0 = arith.constant 0 : i32
    %c0_i32_1 = arith.constant 0 : i32
    return %arg0, %c0_i32, %c0_i32_0 : i32, i32, i32
  }
  func.func @transform_2(%arg0: i32, %arg1: i32) -> (i32, i32, i32) {
    %c2_i32 = arith.constant 2 : i32
    %0 = arith.muli %c2_i32, %arg1 : i32
    %c0_i32 = arith.constant 0 : i32
    %1 = arith.subi %c0_i32, %0 : i32
    %2 = arith.muli %arg0, %1 : i32
    %3 = arith.addi %arg1, %2 : i32
    %c0_i32_0 = arith.constant 0 : i32
    %c0_i32_1 = arith.constant 0 : i32
    return %3, %c0_i32_0, %arg0 : i32, i32, i32
  }
}

</mosaic_0001>

<bundles_post_ra>
// kernel: bilstm_encoder_forward.2
= control target key start
LH: loop header
LB: loop body
LE: loop exit
PB: predicated region body
PF: predicated region fallthrough
CT: control target
= control target key end

     0   :  { %s2888_s9 = smov 0   ;;  %s2890_s10 = smov 0   ;;  %s3515_s0 = inlined_call_operand.vmem [shape: f32[8,8,1024], index: 0, kind: input, shape index: {}]   ;;  %s3516_s1 = inlined_call_operand.vmem [shape: f32[2,128,512], index: 1, kind: input, shape index: {}]   ;;  %s3517_s2 = inlined_call_operand.vmem [shape: f32[8,8,256], index: 2, kind: output, shape index: {}]  }
   0x1   :  { %s2892_s11 = smov 0   ;;  %s2894_s12 = smov 0  }
   0x2   :  { %s2896_s13 = smov 0  }
   0x3 LB: > { %s24_s14 = sadd.s32 1, %s2866_s12  ;;  %s2059_s15 = sadd.s32 4294967295, %s2870_s13   ;;  %s2870_s13 = sphi %s2896_s13, %s12_s13   ;;  %s2866_s12 = sphi %s2894_s12, %s3522_s12   ;;  %s2862_s11 = sphi %s2892_s11, %s3521_s11   ;;  %s2858_s10 = sphi %s2890_s10, %s3520_s10   ;;  %s2854_s9 = sphi %s2888_s9, %s3519_s9  }
   0x4   : > { %p26_p0 = scmp.ge.s32.totalorder %s24_s14, 2  ;;  %p48_p1 = scmp.ne.s32.totalorder %s2858_s10, %s2854_s9 }
   0x5   : > { %p49_p2 = scmp.eq.s32.totalorder %s2870_s13, 0  ;;  %p114_p4 = scmp.eq.s32.totalorder %s2059_s15, 1 }
   0x6   : > { %s3524_s14 = smov (%p26_p0, %s24_s14), 0  ;;  %s41_s17 = sadd.s32 1, %s2858_s10 }
   0x7   : > { %p50_p3 = por %p49_p2, %p48_p1  ;;  %s37_s16 = ssub.s32 %s2866_s12, %s3524_s14 }
   0x8   : > { %p39_p5 = scmp.eq.s32.totalorder %s37_s16, 0  ;;  %p2923_p6 = por %p114_p4, %p48_p1 }
   0x9   : > { %p2062_p7 = scmp.ge.s32.totalorder %s2870_s13, 2 }
   0xa   : > { %s2928_s19 = scalar_select %p39_p5, %s2858_s10, %s41_s17  }
   0xb   : > { %136 = sbr.rel (%p2062_p7) target bundleno = 38 (0x26), region = 16 }
  0x12   : > { %139 = sbr.rel (!%p50_p3) target bundleno = 38 (0x26), region = 20  ;;  %s141_s20 = sand.u32 (%p50_p3), 1, %s2858_s10  }
  0x13   : > { %s2147_s21 = sshll.u32 (%p50_p3), %s2866_s12, 5  ;;  %s2063_s22 = sshll.u32 (%p50_p3), %s141_s20, 8 }
  0x14   : > { %s2936_s25 = scalar_lea.vmem (%p50_p3), %s3515_s0, %s2147_s21  ;;  %s2941_s26 = scalar_lea.vmem (%p50_p3), [#allocation4], %s2063_s22 }
  0x15   : > { %v166_v0 = vld [vmem:[%s2936_s25] sm:$0xff] (%p50_p3)  ;;  %v168_v1 = vld [vmem:[%s2936_s25 + $0x8] sm:$0xff] (%p50_p3)  ;;  %v170_v2 = vld [vmem:[%s2936_s25 + $0x10] sm:$0xff] (%p50_p3) }
  0x16   : > { %167 = vst [vmem:[%s2941_s26] sm:$0xff] (%p50_p3), %v166_v0  ;;  %169 = vst [vmem:[%s2941_s26 + $0x8] sm:$0xff] (%p50_p3), %v168_v1  ;;  %v172_v3 = vld [vmem:[%s2936_s25 + $0x18] sm:$0xff] (%p50_p3)  ;;  %v174_v4 = vld [vmem:[%s2936_s25 + $0x40] sm:$0xff] (%p50_p3) }
  0x17   : > { %171 = vst [vmem:[%s2941_s26 + $0x10] sm:$0xff] (%p50_p3), %v170_v2  ;;  %v176_v5 = vld [vmem:[%s2936_s25 + $0x48] sm:$0xff] (%p50_p3)  ;;  %173 = vst [vmem:[%s2941_s26 + $0x18] sm:$0xff] (%p50_p3), %v172_v3  ;;  %v178_v6 = vld [vmem:[%s2936_s25 + $0x50] sm:$0xff] (%p50_p3) }
  0x18   : > { %175 = vst [vmem:[%s2941_s26 + $0x20] sm:$0xff] (%p50_p3), %v174_v4  ;;  %177 = vst [vmem:[%s2941_s26 + $0x28] sm:$0xff] (%p50_p3), %v176_v5  ;;  %v180_v7 = vld [vmem:[%s2936_s25 + $0x58] sm:$0xff] (%p50_p3)  ;;  %v182_v8 = vld [vmem:[%s2936_s25 + $0x80] sm:$0xff] (%p50_p3) }
  0x19   : > { %179 = vst [vmem:[%s2941_s26 + $0x30] sm:$0xff] %v178_v6  ;;  %181 = vst [vmem:[%s2941_s26 + $0x38] sm:$0xff] %v180_v7  ;;  %v184_v9 = vld [vmem:[%s2936_s25 + $0x88] sm:$0xff]  ;;  %v186_v10 = vld [vmem:[%s2936_s25 + $0x90] sm:$0xff] }
  0x1a   : > { %183 = vst [vmem:[%s2941_s26 + $0x40] sm:$0xff] %v182_v8  ;;  %v188_v11 = vld [vmem:[%s2936_s25 + $0x98] sm:$0xff]  ;;  %185 = vst [vmem:[%s2941_s26 + $0x48] sm:$0xff] %v184_v9  ;;  %v190_v12 = vld [vmem:[%s2936_s25 + $0xc0] sm:$0xff] }
  0x1b   : > { %187 = vst [vmem:[%s2941_s26 + $0x50] sm:$0xff] %v186_v10  ;;  %189 = vst [vmem:[%s2941_s26 + $0x58] sm:$0xff] %v188_v11  ;;  %v192_v13 = vld [vmem:[%s2936_s25 + $0xc8] sm:$0xff]  ;;  %v194_v14 = vld [vmem:[%s2936_s25 + $0xd0] sm:$0xff] }
  0x1c   : > { %191 = vst [vmem:[%s2941_s26 + $0x60] sm:$0xff] %v190_v12  ;;  %193 = vst [vmem:[%s2941_s26 + $0x68] sm:$0xff] %v192_v13  ;;  %v196_v15 = vld [vmem:[%s2936_s25 + $0xd8] sm:$0xff]  ;;  %v198_v16 = vld [vmem:[%s2936_s25 + $0x100] sm:$0xff] }
  0x1d   : > { %195 = vst [vmem:[%s2941_s26 + $0x70] sm:$0xff] %v194_v14  ;;  %v200_v17 = vld [vmem:[%s2936_s25 + $0x108] sm:$0xff]  ;;  %197 = vst [vmem:[%s2941_s26 + $0x78] sm:$0xff] %v196_v15  ;;  %v202_v18 = vld [vmem:[%s2936_s25 + $0x110] sm:$0xff] }
  0x1e   : > { %199 = vst [vmem:[%s2941_s26 + $0x80] sm:$0xff] %v198_v16  ;;  %201 = vst [vmem:[%s2941_s26 + $0x88] sm:$0xff] %v200_v17  ;;  %v204_v19 = vld [vmem:[%s2936_s25 + $0x118] sm:$0xff]  ;;  %v206_v20 = vld [vmem:[%s2936_s25 + $0x140] sm:$0xff] }
  0x1f   : > { %203 = vst [vmem:[%s2941_s26 + $0x90] sm:$0xff] %v202_v18  ;;  %205 = vst [vmem:[%s2941_s26 + $0x98] sm:$0xff] %v204_v19  ;;  %v208_v21 = vld [vmem:[%s2936_s25 + $0x148] sm:$0xff]  ;;  %v210_v22 = vld [vmem:[%s2936_s25 + $0x150] sm:$0xff] }
  0x20   : > { %207 = vst [vmem:[%s2941_s26 + $0xa0] sm:$0xff] %v206_v20  ;;  %v212_v23 = vld [vmem:[%s2936_s25 + $0x158] sm:$0xff]  ;;  %209 = vst [vmem:[%s2941_s26 + $0xa8] sm:$0xff] %v208_v21  ;;  %v214_v24 = vld [vmem:[%s2936_s25 + $0x180] sm:$0xff] }
  0x21   : > { %211 = vst [vmem:[%s2941_s26 + $0xb0] sm:$0xff] %v210_v22  ;;  %213 = vst [vmem:[%s2941_s26 + $0xb8] sm:$0xff] %v212_v23  ;;  %v216_v25 = vld [vmem:[%s2936_s25 + $0x188] sm:$0xff]  ;;  %v218_v26 = vld [vmem:[%s2936_s25 + $0x190] sm:$0xff] }
  0x22   : > { %215 = vst [vmem:[%s2941_s26 + $0xc0] sm:$0xff] %v214_v24  ;;  %217 = vst [vmem:[%s2941_s26 + $0xc8] sm:$0xff] %v216_v25  ;;  %v220_v27 = vld [vmem:[%s2936_s25 + $0x198] sm:$0xff]  ;;  %v222_v28 = vld [vmem:[%s2936_s25 + $0x1c0] sm:$0xff] }
  0x23   : > { %219 = vst [vmem:[%s2941_s26 + $0xd0] sm:$0xff] %v218_v26  ;;  %v224_v29 = vld [vmem:[%s2936_s25 + $0x1c8] sm:$0xff]  ;;  %221 = vst [vmem:[%s2941_s26 + $0xd8] sm:$0xff] %v220_v27  ;;  %v226_v30 = vld [vmem:[%s2936_s25 + $0x1d0] sm:$0xff] }
  0x24   : > { %223 = vst [vmem:[%s2941_s26 + $0xe0] sm:$0xff] %v222_v28  ;;  %225 = vst [vmem:[%s2941_s26 + $0xe8] sm:$0xff] %v224_v29  ;;  %v228_v31 = vld [vmem:[%s2936_s25 + $0x1d8] sm:$0xff] }
  0x25   : > { %227 = vst [vmem:[%s2941_s26 + $0xf0] sm:$0xff] %v226_v30  ;;  %229 = vst [vmem:[%s2941_s26 + $0xf8] sm:$0xff] %v228_v31 }
  0x26 PF: > { %p2066_p8 = scmp.ge.s32.totalorder %s2870_s13, 1  ;;  %p242_p9 = scmp.lt.s32.totalorder %s2870_s13, 3 }
  0x28   : > { %p243_p10 = pnand %p2066_p8, %p242_p9 }
  0x29   : > { %p280_p11 = scmp.lt.s32.totalorder (!%p243_p10), %s2862_s11, 1  ;;  %v2872_v32 = vmov (!%p243_p10), 0.0   ;;  %s249_s4 = sand.u32 (!%p243_p10), 1, %s2854_s9  }
  0x2a   : > { %246 = sbr.rel (%p243_p10) target bundleno = 2165 (0x875), region = 47  ;;  %433 = vmatprep.mubr.f32.mxu0 (!%p243_p10), %v2872_v32  ;;  %504 = vmatprep.mubr.f32.mxu1 (!%p243_p10), %v2872_v32  ;;  %s2067_s5 = sshll.u32 (!%p243_p10), %s249_s4, 8 }
  0x2b   : > { %s2149_s6 = smul.u32 (!%p243_p10), 224, %s2862_s11  ;;  %s3217_s7 = scalar_lea.vmem (!%p243_p10), [#allocation4], %s2067_s5 }
  0x2c   : > { %s2068_s15 = sshll.u32 (!%p243_p10), %s249_s4, 6  ;;  %s2076_s16 = smul.u32 (!%p243_p10), 56, %s2862_s11 }
  0x2d   : > { %s363_s8 = scalar_lea.vmem (!%p243_p10), %s3217_s7, %s2149_s6 [#allocation4]  ;;  %s3226_s17 = scalar_lea.vmem (!%p243_p10), [#allocation5], %s2068_s15 }
  0x2e   : > { %s543_s20 = scalar_lea.vmem (!%p243_p10), %s3226_s17, %s2076_s16 [#allocation5]  ;;  %s2077_s9 = smul.u32 (!%p243_p10), 160, %s2862_s11 }
  0x2f   : > { %s2085_s22 = smul.u32 (!%p243_p10), 40, %s2862_s11  ;;  %s2105_s30 = sshll.u32 (!%p243_p10), %s2862_s11, 3 }
  0x30   : > { %s1959_s21 = scalar_lea.vmem (!%p243_p10), %s3217_s7, %s2077_s9 [#allocation4]  ;;  %s2087_s24 = smul.u32 (!%p243_p10), 96, %s2862_s11 }
  0x31   : > { %s281_s27 = scalar_select %p280_p11, %s2862_s11, 1 }
  0x32   : > { %s1963_s23 = scalar_lea.vmem %s3226_s17, %s2085_s22 [#allocation5]  ;;  %s1967_s25 = scalar_lea.vmem %s3217_s7, %s2087_s24 [#allocation4] }
  0x33   : > { %s2148_s28 = sshll.u32 %s281_s27, 9  ;;  %s2095_s26 = smul.u32 24, %s2862_s11 }
  0x34   : > { %s3013_s3 = scalar_lea.vmem %s3516_s1, %s2148_s28  ;;  %s2097_s28 = sshll.u32 %s2862_s11, 5 }
  0x35   : > { %v297_v33 = vld [vmem:[%s3013_s3 + $0x8] sm:$0xff]  ;;  %v296_v35 = vld [vmem:[%s3013_s3] sm:$0xff]  ;;  %v299_v51 = vld [vmem:[%s3013_s3 + $0x18] sm:$0xff]  ;;  %s1971_s27 = scalar_lea.vmem %s3226_s17, %s2095_s26 [#allocation5]  ;;  %s1974_s29 = scalar_lea.vmem %s3217_s7, %s2097_s28 [#allocation4] }
  0x36   : > { %v301_v34 = vld [vmem:[%s3013_s3 + $0x28] sm:$0xff]  ;;  %v300_v37 = vld [vmem:[%s3013_s3 + $0x20] sm:$0xff]  ;;  %v303_v52 = vld [vmem:[%s3013_s3 + $0x38] sm:$0xff]  ;;  %s1102_s4 = ssub.s32 4, %s2862_s11  ;;  %s2113_s16 = smul.u32 4294967200, %s2862_s11 }
  0x37   : > { %v3018_v36 = vpack.c.bf16 %v301_v34, %v297_v33  ;;  %v305_v38 = vld [vmem:[%s3013_s3 + $0x48] sm:$0xff]  ;;  %v3023_v40 = vpack.c.bf16 %v300_v37, %v296_v35  ;;  %v304_v42 = vld [vmem:[%s3013_s3 + $0x40] sm:$0xff]  ;;  %v3044_v54 = vpack.c.bf16 %v303_v52, %v299_v51  ;;  %v298_v55 = vld [vmem:[%s3013_s3 + $0x10] sm:$0xff]  ;;  %s2150_s5 = sshll.u32 %s1102_s4, 5  ;;  %s2121_s9 = smul.u32 4294967272, %s2862_s11 }
  0x38   : > { %v309_v39 = vld [vmem:[%s3013_s3 + $0x68] sm:$0xff]  ;;  %v308_v43 = vld [vmem:[%s3013_s3 + $0x60] sm:$0xff]  ;;  %v302_v56 = vld [vmem:[%s3013_s3 + $0x30] sm:$0xff]  ;;  %s1105_s6 = scalar_lea.vmem %s3217_s7, %s2150_s5 [#allocation4]  ;;  %s2123_s22 = smul.u32 4294967136, %s2862_s11 }
  0x39   : > { %v3025_v41 = vpack.c.bf16 %v309_v39, %v305_v38  ;;  %v313_v44 = vld [vmem:[%s3013_s3 + $0x88] sm:$0xff]  ;;  %2152 = vmatprep.subr.bf16.mxu0 %v3018_v36  ;;  %v3033_v46 = vpack.c.bf16 %v308_v43, %v304_v42  ;;  %v312_v47 = vld [vmem:[%s3013_s3 + $0x80] sm:$0xff]  ;;  %v3048_v57 = vpack.c.bf16 %v302_v56, %v298_v55  ;;  %2184 = vmatprep.subr.bf16.mxu1 %v3044_v54  ;;  %v307_v59 = vld [vmem:[%s3013_s3 + $0x58] sm:$0xff]  ;;  %s2131_s24 = smul.u32 4294967256, %s2862_s11 }
  0x3a   : > { %v317_v45 = vld [vmem:[%s3013_s3 + $0xa8] sm:$0xff]  ;;  %2154 = vmatpush1.bf16.msra.mxu0 %v3023_v40  ;;  %v316_v48 = vld [vmem:[%s3013_s3 + $0xa0] sm:$0xff]  ;;  %v311_v60 = vld [vmem:[%s3013_s3 + $0x78] sm:$0xff]  ;;  %s2133_s26 = smul.u32 4294967072, %s2862_s11 }
  0x3b   : > { %2156 = vmatprep.subr.bf16.mxu0 %v3025_v41  ;;  %v3038_v49 = vpack.c.bf16 %v317_v45, %v313_v44  ;;  %v321_v50 = vld [vmem:[%s3013_s3 + $0xc8] sm:$0xff]  ;;  %v3051_v58 = vpack.c.bf16 %v316_v48, %v312_v47  ;;  %v306_v61 = vld [vmem:[%s3013_s3 + $0x50] sm:$0xff]  ;;  %v320_v63 = vld [vmem:[%s3013_s3 + $0xc0] sm:$0xff]  ;;  %2186 = vmatpush1.bf16.msra.mxu1 %v3048_v57  ;;  %v3063_v1 = vpack.c.bf16 %v311_v60, %v307_v59 }
  0x3c   : > { %v325_v53 = vld [vmem:[%s3013_s3 + $0xe8] sm:$0xff]  ;;  %v324_v0 = vld [vmem:[%s3013_s3 + $0xe0] sm:$0xff]  ;;  %v310_v2 = vld [vmem:[%s3013_s3 + $0x70] sm:$0xff] }
  0x3d   : > { %v3058_v62 = vpack.c.bf16 %v325_v53, %v321_v50  ;;  %v329_v3 = vld [vmem:[%s3013_s3 + $0x108] sm:$0xff]  ;;  %v3068_v5 = vpack.c.bf16 %v310_v2, %v306_v61  ;;  %v315_v6 = vld [vmem:[%s3013_s3 + $0x98] sm:$0xff]  ;;  %2188 = vmatprep.subr.bf16.mxu1 %v3063_v1  ;;  %v314_v8 = vld [vmem:[%s3013_s3 + $0x90] sm:$0xff]  ;;  %v3076_v10 = vpack.c.bf16 %v324_v0, %v320_v63 }
  0x3e   : > { %2158 = vmatpush1.bf16.msra.mxu0 %v3033_v46  ;;  %v333_v4 = vld [vmem:[%s3013_s3 + $0x128] sm:$0xff]  ;;  %v319_v7 = vld [vmem:[%s3013_s3 + $0xb8] sm:$0xff]  ;;  %v318_v9 = vld [vmem:[%s3013_s3 + $0xb0] sm:$0xff] }
  0x3f   : > { %2160 = vmatprep.subr.bf16.mxu0 %v3038_v49  ;;  %v328_v11 = vld [vmem:[%s3013_s3 + $0x100] sm:$0xff]  ;;  %v3080_v13 = vpack.c.bf16 %v319_v7, %v315_v6  ;;  %v3083_v14 = vpack.c.bf16 %v333_v4, %v329_v3  ;;  %2190 = vmatpush1.bf16.msra.mxu1 %v3068_v5  ;;  %v337_v15 = vld [vmem:[%s3013_s3 + $0x148] sm:$0xff]  ;;  %v3087_v16 = vpack.c.bf16 %v318_v9, %v314_v8  ;;  %v323_v17 = vld [vmem:[%s3013_s3 + $0xd8] sm:$0xff] }
  0x40   : > { %v332_v12 = vld [vmem:[%s3013_s3 + $0x120] sm:$0xff]  ;;  %v327_v18 = vld [vmem:[%s3013_s3 + $0xf8] sm:$0xff]  ;;  %v341_v19 = vld [vmem:[%s3013_s3 + $0x168] sm:$0xff] }
  0x41   : > { %2192 = vmatprep.subr.bf16.mxu1 %v3080_v13  ;;  %v3093_v20 = vpack.c.bf16 %v327_v18, %v323_v17  ;;  %v322_v21 = vld [vmem:[%s3013_s3 + $0xd0] sm:$0xff]  ;;  %v3098_v23 = vpack.c.bf16 %v332_v12, %v328_v11  ;;  %v331_v24 = vld [vmem:[%s3013_s3 + $0x118] sm:$0xff]  ;;  %v3103_v26 = vpack.c.bf16 %v341_v19, %v337_v15  ;;  %v336_v27 = vld [vmem:[%s3013_s3 + $0x140] sm:$0xff] }
  0x42   : > { %2162 = vmatpush1.bf16.msra.mxu0 %v3051_v58  ;;  %v326_v22 = vld [vmem:[%s3013_s3 + $0xf0] sm:$0xff]  ;;  %v335_v25 = vld [vmem:[%s3013_s3 + $0x138] sm:$0xff]  ;;  %v340_v28 = vld [vmem:[%s3013_s3 + $0x160] sm:$0xff] }
  0x43   : > { %2164 = vmatprep.subr.bf16.mxu0 %v3058_v62  ;;  %2194 = vmatpush1.bf16.msra.mxu1 %v3087_v16  ;;  %v345_v29 = vld [vmem:[%s3013_s3 + $0x188] sm:$0xff]  ;;  %v3109_v30 = vpack.c.bf16 %v326_v22, %v322_v21  ;;  %v3113_v33 = vpack.c.bf16 %v335_v25, %v331_v24  ;;  %v330_v34 = vld [vmem:[%s3013_s3 + $0x110] sm:$0xff]  ;;  %v339_v37 = vld [vmem:[%s3013_s3 + $0x158] sm:$0xff]  ;;  %v3120_v39 = vpack.c.bf16 %v340_v28, %v336_v27 }
  0x44   : > { %v349_v31 = vld [vmem:[%s3013_s3 + $0x1a8] sm:$0xff]  ;;  %2196 = vmatprep.subr.bf16.mxu1 %v3093_v20  ;;  %v334_v35 = vld [vmem:[%s3013_s3 + $0x130] sm:$0xff]  ;;  %v343_v38 = vld [vmem:[%s3013_s3 + $0x178] sm:$0xff] }
  0x45   : > { %v3123_v42 = vpack.c.bf16 %v349_v31, %v345_v29  ;;  %v344_v43 = vld [vmem:[%s3013_s3 + $0x180] sm:$0xff]  ;;  %v353_v45 = vld [vmem:[%s3013_s3 + $0x1c8] sm:$0xff]  ;;  %v3129_v47 = vpack.c.bf16 %v334_v35, %v330_v34  ;;  %v3133_v50 = vpack.c.bf16 %v343_v38, %v339_v37  ;;  %v338_v51 = vld [vmem:[%s3013_s3 + $0x150] sm:$0xff] }
  0x46   : > { %2166 = vmatpush1.bf16.msra.mxu0 %v3076_v10  ;;  %v348_v44 = vld [vmem:[%s3013_s3 + $0x1a0] sm:$0xff]  ;;  %v357_v48 = vld [vmem:[%s3013_s3 + $0x1e8] sm:$0xff]  ;;  %v342_v52 = vld [vmem:[%s3013_s3 + $0x170] sm:$0xff] }
  0x47   : > { %2168 = vmatprep.subr.bf16.mxu0 %v3083_v14  ;;  %2198 = vmatpush1.bf16.msra.mxu1 %v3109_v30  ;;  %v347_v53 = vld [vmem:[%s3013_s3 + $0x198] sm:$0xff]  ;;  %v3140_v56 = vpack.c.bf16 %v348_v44, %v344_v43  ;;  %v3143_v59 = vpack.c.bf16 %v357_v48, %v353_v45  ;;  %v352_v60 = vld [vmem:[%s3013_s3 + $0x1c0] sm:$0xff]  ;;  %v3148_v63 = vpack.c.bf16 %v342_v52, %v338_v51  ;;  %v346_v2 = vld [vmem:[%s3013_s3 + $0x190] sm:$0xff] }
  0x48   : > { %2200 = vmatprep.subr.bf16.mxu1 %v3113_v33  ;;  %v351_v55 = vld [vmem:[%s3013_s3 + $0x1b8] sm:$0xff]  ;;  %v356_v61 = vld [vmem:[%s3013_s3 + $0x1e0] sm:$0xff]  ;;  %v350_v3 = vld [vmem:[%s3013_s3 + $0x1b0] sm:$0xff] }
  0x49   : > { %v3151_v0 = vpack.c.bf16 %v351_v55, %v347_v53  ;;  %v355_v4 = vld [vmem:[%s3013_s3 + $0x1d8] sm:$0xff]  ;;  %v3158_v7 = vpack.c.bf16 %v356_v61, %v352_v60  ;;  %v3162_v8 = vpack.c.bf16 %v350_v3, %v346_v2  ;;  %v354_v11 = vld [vmem:[%s3013_s3 + $0x1d0] sm:$0xff]  ;;  %v364_v17 = vld [vmem:[%s363_s8] sm:$0xff] }
  0x4a   : > { %2170 = vmatpush1.bf16.msra.mxu0 %v3098_v23  ;;  %v359_v6 = vld [vmem:[%s3013_s3 + $0x1f8] sm:$0xff]  ;;  %v358_v12 = vld [vmem:[%s3013_s3 + $0x1f0] sm:$0xff]  ;;  %v365_v18 = vld [vmem:[%s363_s8 + $0x8] sm:$0xff]  ;;  %s1977_s3 = scalar_lea.vmem %s3226_s17, %s2105_s30 [#allocation5] }
  0x4b   : > { %2172 = vmatprep.subr.bf16.mxu0 %v3103_v26  ;;  %2202 = vmatpush1.bf16.msra.mxu1 %v3129_v47  ;;  %v3165_v9 = vpack.c.bf16 %v359_v6, %v355_v4  ;;  %v3171_v15 = vpack.c.bf16 %v358_v12, %v354_v11  ;;  %v367_v28 = vld [vmem:[%s363_s8 + $0x18] sm:$0xff]  ;;  %v366_v35 = vld [vmem:[%s363_s8 + $0x10] sm:$0xff]  ;;  %v2078_v12 = vld [vmem:[%s1959_s21 + $0x20] sm:$0xff]  ;;  %s2112_s8 = sshll.u32 %s1102_s4, 3  ;;  %s1860_s4 = scalar_lea.vmem (%p2923_p6), %s3517_s2, %s2105_s30 }
  0x4c   : > { %2204 = vmatprep.subr.bf16.mxu1 %v3133_v50  ;;  %s1285_s15 = scalar_lea.vmem %s3226_s17, %s2112_s8 [#allocation5] }
  0x4e   : > { %2174 = vmatpush1.bf16.msra.mxu0 %v3120_v39 }
  0x4f   : > { %2176 = vmatprep.subr.bf16.mxu0 %v3123_v42  ;;  %2206 = vmatpush1.bf16.msra.mxu1 %v3148_v63 }
  0x50   : > { %2208 = vmatprep.subr.bf16.mxu1 %v3151_v0 }
  0x52   : > { %2178 = vmatpush1.bf16.msra.mxu0 %v3140_v56 }
  0x53   : > { %2180 = vmatprep.subr.bf16.mxu0 %v3143_v59  ;;  %2210 = vmatpush1.bf16.msra.mxu1 %v3162_v8 }
  0x54   : > { %2212 = vmatprep.subr.bf16.mxu1 %v3165_v9 }
  0x56   : > { %2182 = vmatpush1.bf16.msra.mxu0 %v3158_v7 }
  0x57   : > { %2216 = vmatprep.subr.bf16.mxu0 %v3018_v36  ;;  %2214 = vmatpush1.bf16.msra.mxu1 %v3171_v15 }
  0x58   : > { %2248 = vmatprep.subr.bf16.mxu1 %v3044_v54 }
  0x59   : > { %434 = vmatmul.mubr.f32.vlgmr.msra.gmra.mrb[0].mxu0 %v2872_v32 }
  0x5a   : > { %2218 = vmatpush1.bf16.msra.mxu0 %v3023_v40  ;;  %619 = vmatprep.mubr.f32.mxu0 %v2872_v32 }
  0x5b   : > { %2220 = vmatprep.subr.bf16.mxu0 %v3025_v41  ;;  %505 = vmatmul.mubr.f32.vlgmr.msra.gmra.mrb[0].mxu1 %v2872_v32 }
  0x5c   : > { %2250 = vmatpush1.bf16.msra.mxu1 %v3048_v57  ;;  %690 = vmatprep.mubr.f32.mxu1 %v2872_v32 }
  0x5d   : > { %2252 = vmatprep.subr.bf16.mxu1 %v3063_v1 }
  0x5e   : > { %2222 = vmatpush1.bf16.msra.mxu0 %v3033_v46 }
  0x5f   : > { %2224 = vmatprep.subr.bf16.mxu0 %v3038_v49 }
  0x60   : > { %2254 = vmatpush1.bf16.msra.mxu1 %v3068_v5 }
  0x61   : > { %2256 = vmatprep.subr.bf16.mxu1 %v3080_v13 }
  0x62   : > { %2226 = vmatpush1.bf16.msra.mxu0 %v3051_v58 }
  0x63   : > { %2228 = vmatprep.subr.bf16.mxu0 %v3058_v62 }
  0x64   : > { %2258 = vmatpush1.bf16.msra.mxu1 %v3087_v16 }
  0x65   : > { %2260 = vmatprep.subr.bf16.mxu1 %v3093_v20 }
  0x66   : > { %2230 = vmatpush1.bf16.msra.mxu0 %v3076_v10 }
  0x67   : > { %2232 = vmatprep.subr.bf16.mxu0 %v3083_v14 }
  0x68   : > { %2262 = vmatpush1.bf16.msra.mxu1 %v3109_v30 }
  0x69   : > { %2264 = vmatprep.subr.bf16.mxu1 %v3113_v33 }
  0x6a   : > { %2234 = vmatpush1.bf16.msra.mxu0 %v3098_v23 }
  0x6b   : > { %2236 = vmatprep.subr.bf16.mxu0 %v3103_v26 }
  0x6c   : > { %2266 = vmatpush1.bf16.msra.mxu1 %v3129_v47 }
  0x6d   : > { %2268 = vmatprep.subr.bf16.mxu1 %v3133_v50 }
  0x6e   : > { %2238 = vmatpush1.bf16.msra.mxu0 %v3120_v39 }
  0x6f   : > { %2240 = vmatprep.subr.bf16.mxu0 %v3123_v42 }
  0x70   : > { %2270 = vmatpush1.bf16.msra.mxu1 %v3148_v63 }
  0x71   : > { %2272 = vmatprep.subr.bf16.mxu1 %v3151_v0 }
  0x72   : > { %2242 = vmatpush1.bf16.msra.mxu0 %v3140_v56 }
  0x73   : > { %2244 = vmatprep.subr.bf16.mxu0 %v3143_v59 }
  0x74   : > { %2274 = vmatpush1.bf16.msra.mxu1 %v3162_v8 }
  0x75   : > { %2276 = vmatprep.subr.bf16.mxu1 %v3165_v9 }
  0x76   : > { %2246 = vmatpush1.bf16.msra.mxu0 %v3158_v7 }
  0x77   : > { %2280 = vmatprep.subr.bf16.mxu0 %v3018_v36 }
  0x78   : > { %2278 = vmatpush1.bf16.msra.mxu1 %v3171_v15 }
  0x79   : > { %2312 = vmatprep.subr.bf16.mxu1 %v3044_v54 }
 0x12c   : > { %v435_v19 = vpop.f32.mrb[0].mxu0 }
 0x12d   : > { %v511_v21 = vadd.f32 %v435_v19, %v364_v17  ;;  %v437_v22 = vpop.f32.mrb[1].mxu0  ;;  %v2079_v17 = vld [vmem:[%s1959_s21 + $0x28] sm:$0xff] }
 0x12e   : > { %v512_v24 = vadd.f32 %v437_v22, %v365_v18  ;;  %v506_v29 = vpop.f32.mrb[0].mxu1 }
 0x12f   : > { %v2073_v25 = vmul.f32 -1.442695, %v511_v21  ;;  %v508_v31 = vpop.f32.mrb[1].mxu1  ;;  %v513_v38 = vadd.f32 %v506_v29, %v366_v35  ;;  %v2081_v29 = vld [vmem:[%s1959_s21 + $0x38] sm:$0xff] }
 0x130   : > { %v2074_v27 = vmul.f32 -1.442695, %v512_v24  ;;  %v514_v34 = vadd.f32 %v508_v31, %v367_v28 }
 0x131   : > { %2704 = vpow2.f32 %v2073_v25 }
 0x132   : > { %2706 = vpow2.f32 %v2074_v27  ;;  %v2075_v37 = vmul.f32 -1.442695, %v514_v34  ;;  %v2080_v34 = vld [vmem:[%s1959_s21 + $0x30] sm:$0xff]  ;;  %s1989_s21 = scalar_lea.vmem %s3226_s17, %s2121_s9 [#allocation5] }
 0x134   : > { %2708 = vpow2.f32 %v2075_v37 }
 0x135   : > { %2710 = vtanh.f32 %v513_v38 }
 0x13b   : > { %v2705_v43 = vpop.eup %2704 }
 0x13c   : > { %v2707_v44 = vpop.eup %2706  ;;  %v518_v45 = vadd.f32 1.0, %v2705_v43 }
 0x13d   : > { %v524_v48 = vadd.f32 1.0, %v2707_v44 }
 0x13e   : > { %2712 = vrcp.f32 %v518_v45  ;;  %v2709_v51 = vpop.eup %2708 }
 0x13f   : > { %2714 = vrcp.f32 %v524_v48  ;;  %v2711_v52 = vpop.eup %2710  ;;  %v531_v55 = vadd.f32 1.0, %v2709_v51 }
 0x141   : > { %2716 = vrcp.f32 %v531_v55 }
 0x148   : > { %v2713_v53 = vpop.eup %2712 }
 0x149   : > { %v2715_v60 = vpop.eup %2714  ;;  %v536_v61 = vmul.f32 %v2713_v53, %v2711_v52 }
 0x14a   : > { %v535_v2 = vmul.f32 0.0, %v2715_v60 }
 0x14b   : > { %v2717_v4 = vpop.eup %2716 }
 0x14c   : > { %v3220_v3 = vadd.f32 %v536_v61, %v535_v2 }
 0x14e   : > { %2718 = vtanh.f32 %v3220_v3 }
 0x158   : > { %v2719_v6 = vpop.eup %2718 }
 0x159   : > { %v539_v11 = vmul.f32 %v2719_v6, %v2717_v4 }
 0x15b   : > { %544 = vst [vmem:[%s543_s20] sm:$0xff] %v539_v11  ;;  %620 = vmatmul.mubr.f32.vlgmr.msra.gmra.mrb[2].mxu0 %v539_v11  ;;  %691 = vmatmul.mubr.f32.vlgmr.msra.gmra.mrb[2].mxu1 %v539_v11  ;;  %s1985_s20 = scalar_lea.vmem %s3217_s7, %s2113_s16 [#allocation4] }
 0x15c   : > { %2282 = vmatpush1.bf16.msra.mxu0 %v3023_v40  ;;  %2314 = vmatpush1.bf16.msra.mxu1 %v3048_v57 }
 0x15d   : > { %2284 = vmatprep.subr.bf16.mxu0 %v3025_v41  ;;  %2316 = vmatprep.subr.bf16.mxu1 %v3063_v1 }
 0x15e   : > { %805 = vmatprep.mubr.f32.mxu0 %v2872_v32  ;;  %876 = vmatprep.mubr.f32.mxu1 %v2872_v32 }
 0x160   : > { %2286 = vmatpush1.bf16.msra.mxu0 %v3033_v46  ;;  %2318 = vmatpush1.bf16.msra.mxu1 %v3068_v5 }
 0x161   : > { %2288 = vmatprep.subr.bf16.mxu0 %v3038_v49  ;;  %2320 = vmatprep.subr.bf16.mxu1 %v3080_v13 }
 0x164   : > { %2290 = vmatpush1.bf16.msra.mxu0 %v3051_v58  ;;  %2322 = vmatpush1.bf16.msra.mxu1 %v3087_v16 }
 0x165   : > { %2292 = vmatprep.subr.bf16.mxu0 %v3058_v62  ;;  %2324 = vmatprep.subr.bf16.mxu1 %v3093_v20 }
 0x168   : > { %2294 = vmatpush1.bf16.msra.mxu0 %v3076_v10  ;;  %2326 = vmatpush1.bf16.msra.mxu1 %v3109_v30 }
 0x169   : > { %2296 = vmatprep.subr.bf16.mxu0 %v3083_v14  ;;  %2328 = vmatprep.subr.bf16.mxu1 %v3113_v33 }
 0x16c   : > { %2298 = vmatpush1.bf16.msra.mxu0 %v3098_v23  ;;  %2330 = vmatpush1.bf16.msra.mxu1 %v3129_v47 }
 0x16d   : > { %2300 = vmatprep.subr.bf16.mxu0 %v3103_v26  ;;  %2332 = vmatprep.subr.bf16.mxu1 %v3133_v50 }
 0x170   : > { %2302 = vmatpush1.bf16.msra.mxu0 %v3120_v39  ;;  %2334 = vmatpush1.bf16.msra.mxu1 %v3148_v63 }
 0x171   : > { %2304 = vmatprep.subr.bf16.mxu0 %v3123_v42  ;;  %2336 = vmatprep.subr.bf16.mxu1 %v3151_v0 }
 0x174   : > { %2306 = vmatpush1.bf16.msra.mxu0 %v3140_v56  ;;  %2338 = vmatpush1.bf16.msra.mxu1 %v3162_v8 }
 0x175   : > { %2308 = vmatprep.subr.bf16.mxu0 %v3143_v59  ;;  %2340 = vmatprep.subr.bf16.mxu1 %v3165_v9 }
 0x178   : > { %2310 = vmatpush1.bf16.msra.mxu0 %v3158_v7  ;;  %2342 = vmatpush1.bf16.msra.mxu1 %v3171_v15 }
 0x179   : > { %2344 = vmatprep.subr.bf16.mxu0 %v3018_v36  ;;  %2376 = vmatprep.subr.bf16.mxu1 %v3044_v54 }
 0x22e   : > { %v621_v18 = vpop.f32.mrb[2].mxu0  ;;  %v692_v19 = vpop.f32.mrb[2].mxu1 }
 0x22f   : > { %v697_v21 = vadd.f32 %v2078_v12, %v621_v18  ;;  %v623_v22 = vpop.f32.mrb[3].mxu0  ;;  %v694_v24 = vpop.f32.mrb[3].mxu1  ;;  %v699_v37 = vadd.f32 %v2080_v34, %v692_v19  ;;  %v2089_v12 = vld [vmem:[%s1967_s25 + $0x48] sm:$0xff] }
 0x230   : > { %v698_v25 = vadd.f32 %v2079_v17, %v623_v22  ;;  %v700_v31 = vadd.f32 %v2081_v29, %v694_v24 }
 0x231   : > { %v2082_v27 = vmul.f32 -1.442695, %v697_v21 }
 0x232   : > { %v2083_v28 = vmul.f32 -1.442695, %v698_v25  ;;  %v2084_v35 = vmul.f32 -1.442695, %v700_v31  ;;  %v2090_v31 = vld [vmem:[%s1967_s25 + $0x50] sm:$0xff] }
 0x233   : > { %2720 = vpow2.f32 %v2082_v27 }
 0x234   : > { %2722 = vpow2.f32 %v2083_v28  ;;  %v2091_v28 = vld [vmem:[%s1967_s25 + $0x58] sm:$0xff] }
 0x235   : > { %2724 = vpow2.f32 %v2084_v35 }
 0x236   : > { %2726 = vtanh.f32 %v699_v37 }
 0x23d   : > { %v2721_v38 = vpop.eup %2720 }
 0x23e   : > { %v2723_v43 = vpop.eup %2722  ;;  %v704_v44 = vadd.f32 1.0, %v2721_v38 }
 0x23f   : > { %v710_v45 = vadd.f32 1.0, %v2723_v43  ;;  %v2725_v48 = vpop.eup %2724 }
 0x240   : > { %2728 = vrcp.f32 %v704_v44  ;;  %v2727_v51 = vpop.eup %2726  ;;  %v717_v60 = vadd.f32 1.0, %v2725_v48 }
 0x241   : > { %2730 = vrcp.f32 %v710_v45 }
 0x242   : > { %2732 = vrcp.f32 %v717_v60 }
 0x24a   : > { %v2729_v52 = vpop.eup %2728 }
 0x24b   : > { %v2731_v53 = vpop.eup %2730  ;;  %v722_v55 = vmul.f32 %v2729_v52, %v2727_v51 }
 0x24c   : > { %v721_v61 = vmul.f32 %v2731_v53, %v3220_v3  ;;  %v2733_v4 = vpop.eup %2732  ;;  %v2088_v3 = vld [vmem:[%s1967_s25 + $0x40] sm:$0xff]  ;;  %s1997_s25 = scalar_lea.vmem %s3226_s17, %s2131_s24 [#allocation5] }
 0x24e   : > { %v3266_v2 = vadd.f32 %v722_v55, %v721_v61 }
 0x250   : > { %2734 = vtanh.f32 %v3266_v2 }
 0x25a   : > { %v2735_v6 = vpop.eup %2734 }
 0x25b   : > { %v725_v11 = vmul.f32 %v2735_v6, %v2733_v4 }
 0x25d   : > { %2086 = vst [vmem:[%s1963_s23 + $0x8] sm:$0xff] %v725_v11  ;;  %806 = vmatmul.mubr.f32.vlgmr.msra.gmra.mrb[4].mxu0 %v725_v11  ;;  %877 = vmatmul.mubr.f32.vlgmr.msra.gmra.mrb[4].mxu1 %v725_v11  ;;  %s1993_s23 = scalar_lea.vmem %s3217_s7, %s2123_s22 [#allocation4] }
 0x25e   : > { %2346 = vmatpush1.bf16.msra.mxu0 %v3023_v40  ;;  %2378 = vmatpush1.bf16.msra.mxu1 %v3048_v57 }
 0x25f   : > { %2348 = vmatprep.subr.bf16.mxu0 %v3025_v41  ;;  %2380 = vmatprep.subr.bf16.mxu1 %v3063_v1 }
 0x260   : > { %990 = vmatprep.mubr.f32.mxu0 %v2872_v32  ;;  %1061 = vmatprep.mubr.f32.mxu1 %v2872_v32 }
 0x262   : > { %2350 = vmatpush1.bf16.msra.mxu0 %v3033_v46  ;;  %2382 = vmatpush1.bf16.msra.mxu1 %v3068_v5 }
 0x263   : > { %2352 = vmatprep.subr.bf16.mxu0 %v3038_v49  ;;  %2384 = vmatprep.subr.bf16.mxu1 %v3080_v13 }
 0x266   : > { %2354 = vmatpush1.bf16.msra.mxu0 %v3051_v58  ;;  %2386 = vmatpush1.bf16.msra.mxu1 %v3087_v16 }
 0x267   : > { %2356 = vmatprep.subr.bf16.mxu0 %v3058_v62  ;;  %2388 = vmatprep.subr.bf16.mxu1 %v3093_v20 }
 0x26a   : > { %2358 = vmatpush1.bf16.msra.mxu0 %v3076_v10  ;;  %2390 = vmatpush1.bf16.msra.mxu1 %v3109_v30 }
 0x26b   : > { %2360 = vmatprep.subr.bf16.mxu0 %v3083_v14  ;;  %2392 = vmatprep.subr.bf16.mxu1 %v3113_v33 }
 0x26e   : > { %2362 = vmatpush1.bf16.msra.mxu0 %v3098_v23  ;;  %2394 = vmatpush1.bf16.msra.mxu1 %v3129_v47 }
 0x26f   : > { %2364 = vmatprep.subr.bf16.mxu0 %v3103_v26  ;;  %2396 = vmatprep.subr.bf16.mxu1 %v3133_v50 }
 0x272   : > { %2366 = vmatpush1.bf16.msra.mxu0 %v3120_v39  ;;  %2398 = vmatpush1.bf16.msra.mxu1 %v3148_v63 }
 0x273   : > { %2368 = vmatprep.subr.bf16.mxu0 %v3123_v42  ;;  %2400 = vmatprep.subr.bf16.mxu1 %v3151_v0 }
 0x276   : > { %2370 = vmatpush1.bf16.msra.mxu0 %v3140_v56  ;;  %2402 = vmatpush1.bf16.msra.mxu1 %v3162_v8 }
 0x277   : > { %2372 = vmatprep.subr.bf16.mxu0 %v3143_v59  ;;  %2404 = vmatprep.subr.bf16.mxu1 %v3165_v9 }
 0x27a   : > { %2374 = vmatpush1.bf16.msra.mxu0 %v3158_v7  ;;  %2406 = vmatpush1.bf16.msra.mxu1 %v3171_v15 }
 0x27b   : > { %2408 = vmatprep.subr.bf16.mxu0 %v3018_v36  ;;  %2440 = vmatprep.subr.bf16.mxu1 %v3044_v54 }
 0x330   : > { %v807_v17 = vpop.f32.mrb[4].mxu0  ;;  %v878_v18 = vpop.f32.mrb[4].mxu1 }
 0x331   : > { %v883_v19 = vadd.f32 %v2088_v3, %v807_v17  ;;  %v809_v21 = vpop.f32.mrb[5].mxu0  ;;  %v880_v22 = vpop.f32.mrb[5].mxu1  ;;  %v885_v35 = vadd.f32 %v2090_v31, %v878_v18  ;;  %v2099_v3 = vld [vmem:[%s1974_s29 + $0x68] sm:$0xff] }
 0x332   : > { %v884_v24 = vadd.f32 %v2089_v12, %v809_v21  ;;  %v886_v29 = vadd.f32 %v2091_v28, %v880_v22 }
 0x333   : > { %v2092_v25 = vmul.f32 -1.442695, %v883_v19 }
 0x334   : > { %v2093_v27 = vmul.f32 -1.442695, %v884_v24  ;;  %v2094_v34 = vmul.f32 -1.442695, %v886_v29  ;;  %v2100_v29 = vld [vmem:[%s1974_s29 + $0x70] sm:$0xff] }
 0x335   : > { %2736 = vpow2.f32 %v2092_v25 }
 0x336   : > { %2738 = vpow2.f32 %v2093_v27  ;;  %v2101_v27 = vld [vmem:[%s1974_s29 + $0x78] sm:$0xff] }
 0x337   : > { %2740 = vpow2.f32 %v2094_v34 }
 0x338   : > { %2742 = vtanh.f32 %v885_v35 }
 0x33f   : > { %v2737_v37 = vpop.eup %2736 }
 0x340   : > { %v2739_v38 = vpop.eup %2738  ;;  %v890_v43 = vadd.f32 1.0, %v2737_v37 }
 0x341   : > { %v896_v44 = vadd.f32 1.0, %v2739_v38  ;;  %v2741_v45 = vpop.eup %2740 }
 0x342   : > { %2744 = vrcp.f32 %v890_v43  ;;  %v2743_v48 = vpop.eup %2742  ;;  %v903_v55 = vadd.f32 1.0, %v2741_v45 }
 0x343   : > { %2746 = vrcp.f32 %v896_v44 }
 0x344   : > { %2748 = vrcp.f32 %v903_v55 }
 0x34c   : > { %v2745_v51 = vpop.eup %2744 }
 0x34d   : > { %v2747_v52 = vpop.eup %2746  ;;  %v908_v53 = vmul.f32 %v2745_v51, %v2743_v48 }
 0x34e   : > { %v907_v60 = vmul.f32 %v2747_v52, %v3266_v2  ;;  %v2749_v4 = vpop.eup %2748  ;;  %v2098_v2 = vld [vmem:[%s1974_s29 + $0x60] sm:$0xff] }
 0x350   : > { %v3308_v61 = vadd.f32 %v908_v53, %v907_v60 }
 0x352   : > { %2750 = vtanh.f32 %v3308_v61 }
 0x35c   : > { %v2751_v6 = vpop.eup %2750 }
 0x35d   : > { %v911_v11 = vmul.f32 %v2751_v6, %v2749_v4 }
 0x35f   : > { %2096 = vst [vmem:[%s1971_s27 + $0x10] sm:$0xff] %v911_v11  ;;  %991 = vmatmul.mubr.f32.vlgmr.msra.gmra.mrb[6].mxu0 %v911_v11  ;;  %1062 = vmatmul.mubr.f32.vlgmr.msra.gmra.mrb[6].mxu1 %v911_v11  ;;  %s2001_s27 = scalar_lea.vmem %s3217_s7, %s2133_s26 [#allocation4]  ;;  %s2141_s7 = smul.u32 4294967240, %s2862_s11 }
 0x360   : > { %2410 = vmatpush1.bf16.msra.mxu0 %v3023_v40  ;;  %2442 = vmatpush1.bf16.msra.mxu1 %v3048_v57 }
 0x361   : > { %2412 = vmatprep.subr.bf16.mxu0 %v3025_v41  ;;  %2444 = vmatprep.subr.bf16.mxu1 %v3063_v1  ;;  %s2005_s28 = scalar_lea.vmem %s3226_s17, %s2141_s7 [#allocation5] }
 0x362   : > { %1175 = vmatprep.mubr.f32.mxu0 %v2872_v32  ;;  %1246 = vmatprep.mubr.f32.mxu1 %v2872_v32 }
 0x364   : > { %2414 = vmatpush1.bf16.msra.mxu0 %v3033_v46  ;;  %2446 = vmatpush1.bf16.msra.mxu1 %v3068_v5 }
 0x365   : > { %2416 = vmatprep.subr.bf16.mxu0 %v3038_v49  ;;  %2448 = vmatprep.subr.bf16.mxu1 %v3080_v13 }
 0x368   : > { %2418 = vmatpush1.bf16.msra.mxu0 %v3051_v58  ;;  %2450 = vmatpush1.bf16.msra.mxu1 %v3087_v16 }
 0x369   : > { %2420 = vmatprep.subr.bf16.mxu0 %v3058_v62  ;;  %2452 = vmatprep.subr.bf16.mxu1 %v3093_v20 }
 0x36c   : > { %2422 = vmatpush1.bf16.msra.mxu0 %v3076_v10  ;;  %2454 = vmatpush1.bf16.msra.mxu1 %v3109_v30 }
 0x36d   : > { %2424 = vmatprep.subr.bf16.mxu0 %v3083_v14  ;;  %2456 = vmatprep.subr.bf16.mxu1 %v3113_v33 }
 0x370   : > { %2426 = vmatpush1.bf16.msra.mxu0 %v3098_v23  ;;  %2458 = vmatpush1.bf16.msra.mxu1 %v3129_v47 }
 0x371   : > { %2428 = vmatprep.subr.bf16.mxu0 %v3103_v26  ;;  %2460 = vmatprep.subr.bf16.mxu1 %v3133_v50 }
 0x374   : > { %2430 = vmatpush1.bf16.msra.mxu0 %v3120_v39  ;;  %2462 = vmatpush1.bf16.msra.mxu1 %v3148_v63 }
 0x375   : > { %2432 = vmatprep.subr.bf16.mxu0 %v3123_v42  ;;  %2464 = vmatprep.subr.bf16.mxu1 %v3151_v0 }
 0x378   : > { %2434 = vmatpush1.bf16.msra.mxu0 %v3140_v56  ;;  %2466 = vmatpush1.bf16.msra.mxu1 %v3162_v8 }
 0x379   : > { %2436 = vmatprep.subr.bf16.mxu0 %v3143_v59  ;;  %2468 = vmatprep.subr.bf16.mxu1 %v3165_v9 }
 0x37c   : > { %2438 = vmatpush1.bf16.msra.mxu0 %v3158_v7  ;;  %2470 = vmatpush1.bf16.msra.mxu1 %v3171_v15 }
 0x37d   : > { %2472 = vmatprep.subr.bf16.mxu0 %v3018_v36  ;;  %2504 = vmatprep.subr.bf16.mxu1 %v3044_v54 }
 0x432   : > { %v992_v12 = vpop.f32.mrb[6].mxu0  ;;  %v1063_v17 = vpop.f32.mrb[6].mxu1 }
 0x433   : > { %v1068_v18 = vadd.f32 %v2098_v2, %v992_v12  ;;  %v994_v19 = vpop.f32.mrb[7].mxu0  ;;  %v1065_v21 = vpop.f32.mrb[7].mxu1  ;;  %v1070_v34 = vadd.f32 %v2100_v29, %v1063_v17  ;;  %v1107_v2 = vld [vmem:[%s1105_s6 + $0x8] sm:$0xff] }
 0x434   : > { %v1069_v22 = vadd.f32 %v2099_v3, %v994_v19  ;;  %v1071_v28 = vadd.f32 %v2101_v27, %v1065_v21 }
 0x435   : > { %v2102_v24 = vmul.f32 -1.442695, %v1068_v18 }
 0x436   : > { %v2103_v25 = vmul.f32 -1.442695, %v1069_v22  ;;  %v2104_v31 = vmul.f32 -1.442695, %v1071_v28  ;;  %v1108_v28 = vld [vmem:[%s1105_s6 + $0x10] sm:$0xff] }
 0x437   : > { %2752 = vpow2.f32 %v2102_v24 }
 0x438   : > { %2754 = vpow2.f32 %v2103_v25  ;;  %v1109_v25 = vld [vmem:[%s1105_s6 + $0x18] sm:$0xff] }
 0x439   : > { %2756 = vpow2.f32 %v2104_v31 }
 0x43a   : > { %2758 = vtanh.f32 %v1070_v34 }
 0x441   : > { %v2753_v35 = vpop.eup %2752 }
 0x442   : > { %v2755_v37 = vpop.eup %2754  ;;  %v1075_v38 = vadd.f32 1.0, %v2753_v35 }
 0x443   : > { %v1081_v43 = vadd.f32 1.0, %v2755_v37  ;;  %v2757_v44 = vpop.eup %2756 }
 0x444   : > { %2760 = vrcp.f32 %v1075_v38  ;;  %v2759_v45 = vpop.eup %2758  ;;  %v1088_v53 = vadd.f32 1.0, %v2757_v44 }
 0x445   : > { %2762 = vrcp.f32 %v1081_v43 }
 0x446   : > { %2764 = vrcp.f32 %v1088_v53 }
 0x44e   : > { %v2761_v48 = vpop.eup %2760 }
 0x44f   : > { %v2763_v51 = vpop.eup %2762  ;;  %v1093_v52 = vmul.f32 %v2761_v48, %v2759_v45 }
 0x450   : > { %v1092_v55 = vmul.f32 %v2763_v51, %v3308_v61  ;;  %v2765_v4 = vpop.eup %2764  ;;  %v1106_v61 = vld [vmem:[%s1105_s6] sm:$0xff] }
 0x452   : > { %v3350_v60 = vadd.f32 %v1093_v52, %v1092_v55 }
 0x454   : > { %2766 = vtanh.f32 %v3350_v60 }
 0x45e   : > { %v2767_v6 = vpop.eup %2766 }
 0x45f   : > { %v1096_v11 = vmul.f32 %v2767_v6, %v2765_v4 }
 0x461   : > { %2106 = vst [vmem:[%s1977_s3 + $0x18] sm:$0xff] %v1096_v11  ;;  %1176 = vmatmul.mubr.f32.vlgmr.msra.gmra.mrb[8].mxu0 %v1096_v11  ;;  %1247 = vmatmul.mubr.f32.vlgmr.msra.gmra.mrb[8].mxu1 %v1096_v11 }
 0x462   : > { %2474 = vmatpush1.bf16.msra.mxu0 %v3023_v40  ;;  %2506 = vmatpush1.bf16.msra.mxu1 %v3048_v57 }
 0x463   : > { %2476 = vmatprep.subr.bf16.mxu0 %v3025_v41  ;;  %2508 = vmatprep.subr.bf16.mxu1 %v3063_v1 }
 0x464   : > { %1361 = vmatprep.mubr.f32.mxu0 %v2872_v32  ;;  %1432 = vmatprep.mubr.f32.mxu1 %v2872_v32 }
 0x466   : > { %2478 = vmatpush1.bf16.msra.mxu0 %v3033_v46  ;;  %2510 = vmatpush1.bf16.msra.mxu1 %v3068_v5 }
 0x467   : > { %2480 = vmatprep.subr.bf16.mxu0 %v3038_v49  ;;  %2512 = vmatprep.subr.bf16.mxu1 %v3080_v13 }
 0x46a   : > { %2482 = vmatpush1.bf16.msra.mxu0 %v3051_v58  ;;  %2514 = vmatpush1.bf16.msra.mxu1 %v3087_v16 }
 0x46b   : > { %2484 = vmatprep.subr.bf16.mxu0 %v3058_v62  ;;  %2516 = vmatprep.subr.bf16.mxu1 %v3093_v20 }
 0x46e   : > { %2486 = vmatpush1.bf16.msra.mxu0 %v3076_v10  ;;  %2518 = vmatpush1.bf16.msra.mxu1 %v3109_v30 }
 0x46f   : > { %2488 = vmatprep.subr.bf16.mxu0 %v3083_v14  ;;  %2520 = vmatprep.subr.bf16.mxu1 %v3113_v33 }
 0x472   : > { %2490 = vmatpush1.bf16.msra.mxu0 %v3098_v23  ;;  %2522 = vmatpush1.bf16.msra.mxu1 %v3129_v47 }
 0x473   : > { %2492 = vmatprep.subr.bf16.mxu0 %v3103_v26  ;;  %2524 = vmatprep.subr.bf16.mxu1 %v3133_v50 }
 0x476   : > { %2494 = vmatpush1.bf16.msra.mxu0 %v3120_v39  ;;  %2526 = vmatpush1.bf16.msra.mxu1 %v3148_v63 }
 0x477   : > { %2496 = vmatprep.subr.bf16.mxu0 %v3123_v42  ;;  %2528 = vmatprep.subr.bf16.mxu1 %v3151_v0 }
 0x47a   : > { %2498 = vmatpush1.bf16.msra.mxu0 %v3140_v56  ;;  %2530 = vmatpush1.bf16.msra.mxu1 %v3162_v8 }
 0x47b   : > { %2500 = vmatprep.subr.bf16.mxu0 %v3143_v59  ;;  %2532 = vmatprep.subr.bf16.mxu1 %v3165_v9 }
 0x47e   : > { %2502 = vmatpush1.bf16.msra.mxu0 %v3158_v7  ;;  %2534 = vmatpush1.bf16.msra.mxu1 %v3171_v15 }
 0x47f   : > { %2536 = vmatprep.subr.bf16.mxu0 %v3018_v36  ;;  %2568 = vmatprep.subr.bf16.mxu1 %v3044_v54 }
 0x534   : > { %v1177_v3 = vpop.f32.mrb[8].mxu0  ;;  %v1248_v12 = vpop.f32.mrb[8].mxu1 }
 0x535   : > { %v1253_v17 = vadd.f32 %v1177_v3, %v1106_v61  ;;  %v1179_v18 = vpop.f32.mrb[9].mxu0  ;;  %v1250_v19 = vpop.f32.mrb[9].mxu1  ;;  %v1255_v31 = vadd.f32 %v1248_v12, %v1108_v28  ;;  %v2115_v61 = vld [vmem:[%s1985_s20 + $0xa8] sm:$0xff] }
 0x536   : > { %v1254_v21 = vadd.f32 %v1179_v18, %v1107_v2  ;;  %v1256_v27 = vadd.f32 %v1250_v19, %v1109_v25 }
 0x537   : > { %v2109_v22 = vmul.f32 -1.442695, %v1253_v17 }
 0x538   : > { %v2110_v24 = vmul.f32 -1.442695, %v1254_v21  ;;  %v2111_v29 = vmul.f32 -1.442695, %v1256_v27  ;;  %v2116_v27 = vld [vmem:[%s1985_s20 + $0xb0] sm:$0xff] }
 0x539   : > { %2768 = vpow2.f32 %v2109_v22 }
 0x53a   : > { %2770 = vpow2.f32 %v2110_v24  ;;  %v2117_v24 = vld [vmem:[%s1985_s20 + $0xb8] sm:$0xff] }
 0x53b   : > { %2772 = vpow2.f32 %v2111_v29 }
 0x53c   : > { %2774 = vtanh.f32 %v1255_v31 }
 0x543   : > { %v2769_v34 = vpop.eup %2768 }
 0x544   : > { %v2771_v35 = vpop.eup %2770  ;;  %v1260_v37 = vadd.f32 1.0, %v2769_v34 }
 0x545   : > { %v1266_v38 = vadd.f32 1.0, %v2771_v35  ;;  %v2773_v43 = vpop.eup %2772 }
 0x546   : > { %2776 = vrcp.f32 %v1260_v37  ;;  %v2775_v44 = vpop.eup %2774  ;;  %v1273_v52 = vadd.f32 1.0, %v2773_v43 }
 0x547   : > { %2778 = vrcp.f32 %v1266_v38 }
 0x548   : > { %2780 = vrcp.f32 %v1273_v52 }
 0x550   : > { %v2777_v45 = vpop.eup %2776 }
 0x551   : > { %v2779_v48 = vpop.eup %2778  ;;  %v1278_v51 = vmul.f32 %v2777_v45, %v2775_v44 }
 0x552   : > { %v1277_v53 = vmul.f32 %v2779_v48, %v3350_v60  ;;  %v2781_v4 = vpop.eup %2780  ;;  %v2114_v60 = vld [vmem:[%s1985_s20 + $0xa0] sm:$0xff] }
 0x554   : > { %v3396_v55 = vadd.f32 %v1278_v51, %v1277_v53 }
 0x556   : > { %2782 = vtanh.f32 %v3396_v55 }
 0x560   : > { %v2783_v6 = vpop.eup %2782 }
 0x561   : > { %v1281_v11 = vmul.f32 %v2783_v6, %v2781_v4 }
 0x563   : > { %1286 = vst [vmem:[%s1285_s15] sm:$0xff] %v1281_v11  ;;  %1362 = vmatmul.mubr.f32.vlgmr.msra.gmra.mrb[10].mxu0 %v1281_v11  ;;  %1433 = vmatmul.mubr.f32.vlgmr.msra.gmra.mrb[10].mxu1 %v1281_v11 }
 0x564   : > { %2538 = vmatpush1.bf16.msra.mxu0 %v3023_v40  ;;  %2570 = vmatpush1.bf16.msra.mxu1 %v3048_v57 }
 0x565   : > { %2540 = vmatprep.subr.bf16.mxu0 %v3025_v41  ;;  %2572 = vmatprep.subr.bf16.mxu1 %v3063_v1 }
 0x566   : > { %1547 = vmatprep.mubr.f32.mxu0 %v2872_v32  ;;  %1618 = vmatprep.mubr.f32.mxu1 %v2872_v32 }
 0x568   : > { %2542 = vmatpush1.bf16.msra.mxu0 %v3033_v46  ;;  %2574 = vmatpush1.bf16.msra.mxu1 %v3068_v5 }
 0x569   : > { %2544 = vmatprep.subr.bf16.mxu0 %v3038_v49  ;;  %2576 = vmatprep.subr.bf16.mxu1 %v3080_v13 }
 0x56c   : > { %2546 = vmatpush1.bf16.msra.mxu0 %v3051_v58  ;;  %2578 = vmatpush1.bf16.msra.mxu1 %v3087_v16 }
 0x56d   : > { %2548 = vmatprep.subr.bf16.mxu0 %v3058_v62  ;;  %2580 = vmatprep.subr.bf16.mxu1 %v3093_v20 }
 0x570   : > { %2550 = vmatpush1.bf16.msra.mxu0 %v3076_v10  ;;  %2582 = vmatpush1.bf16.msra.mxu1 %v3109_v30 }
 0x571   : > { %2552 = vmatprep.subr.bf16.mxu0 %v3083_v14  ;;  %2584 = vmatprep.subr.bf16.mxu1 %v3113_v33 }
 0x574   : > { %2554 = vmatpush1.bf16.msra.mxu0 %v3098_v23  ;;  %2586 = vmatpush1.bf16.msra.mxu1 %v3129_v47 }
 0x575   : > { %2556 = vmatprep.subr.bf16.mxu0 %v3103_v26  ;;  %2588 = vmatprep.subr.bf16.mxu1 %v3133_v50 }
 0x578   : > { %2558 = vmatpush1.bf16.msra.mxu0 %v3120_v39  ;;  %2590 = vmatpush1.bf16.msra.mxu1 %v3148_v63 }
 0x579   : > { %2560 = vmatprep.subr.bf16.mxu0 %v3123_v42  ;;  %2592 = vmatprep.subr.bf16.mxu1 %v3151_v0 }
 0x57c   : > { %2562 = vmatpush1.bf16.msra.mxu0 %v3140_v56  ;;  %2594 = vmatpush1.bf16.msra.mxu1 %v3162_v8 }
 0x57d   : > { %2564 = vmatprep.subr.bf16.mxu0 %v3143_v59  ;;  %2596 = vmatprep.subr.bf16.mxu1 %v3165_v9 }
 0x580   : > { %2566 = vmatpush1.bf16.msra.mxu0 %v3158_v7  ;;  %2598 = vmatpush1.bf16.msra.mxu1 %v3171_v15 }
 0x581   : > { %2600 = vmatprep.subr.bf16.mxu0 %v3018_v36  ;;  %2632 = vmatprep.subr.bf16.mxu1 %v3044_v54 }
 0x636   : > { %v1363_v2 = vpop.f32.mrb[10].mxu0  ;;  %v1434_v3 = vpop.f32.mrb[10].mxu1 }
 0x637   : > { %v1439_v12 = vadd.f32 %v2114_v60, %v1363_v2  ;;  %v1365_v17 = vpop.f32.mrb[11].mxu0  ;;  %v1436_v18 = vpop.f32.mrb[11].mxu1  ;;  %v1441_v28 = vadd.f32 %v2116_v27, %v1434_v3 }
 0x638   : > { %v1440_v19 = vadd.f32 %v2115_v61, %v1365_v17  ;;  %v1442_v25 = vadd.f32 %v2117_v24, %v1436_v18  ;;  %v2137_v18 = vld [vmem:[%s2001_s27 + $0xf8] sm:$0xff] }
 0x639   : > { %v2118_v21 = vmul.f32 -1.442695, %v1439_v12 }
 0x63a   : > { %v2119_v22 = vmul.f32 -1.442695, %v1440_v19  ;;  %v2120_v36 = vmul.f32 -1.442695, %v1442_v25 }
 0x63b   : > { %2784 = vpow2.f32 %v2118_v21  ;;  %v2136_v21 = vld [vmem:[%s2001_s27 + $0xf0] sm:$0xff] }
 0x63c   : > { %2786 = vpow2.f32 %v2119_v22 }
 0x63d   : > { %2788 = vpow2.f32 %v2120_v36 }
 0x63e   : > { %2790 = vtanh.f32 %v1441_v28 }
 0x645   : > { %v2785_v54 = vpop.eup %2784 }
 0x646   : > { %v2787_v29 = vpop.eup %2786  ;;  %v1446_v31 = vadd.f32 1.0, %v2785_v54 }
 0x647   : > { %v1452_v34 = vadd.f32 1.0, %v2787_v29  ;;  %v2789_v35 = vpop.eup %2788 }
 0x648   : > { %2792 = vrcp.f32 %v1446_v31  ;;  %v2791_v37 = vpop.eup %2790  ;;  %v1459_v45 = vadd.f32 1.0, %v2789_v35 }
 0x649   : > { %2794 = vrcp.f32 %v1452_v34 }
 0x64a   : > { %2796 = vrcp.f32 %v1459_v45 }
 0x652   : > { %v2793_v38 = vpop.eup %2792 }
 0x653   : > { %v2795_v43 = vpop.eup %2794  ;;  %v1464_v44 = vmul.f32 %v2793_v38, %v2791_v37 }
 0x654   : > { %v1463_v48 = vmul.f32 %v2795_v43, %v3396_v55  ;;  %v2797_v52 = vpop.eup %2796  ;;  %v2135_v55 = vld [vmem:[%s2001_s27 + $0xe8] sm:$0xff] }
 0x656   : > { %v3439_v51 = vadd.f32 %v1464_v44, %v1463_v48 }
 0x658   : > { %2798 = vtanh.f32 %v3439_v51 }
 0x662   : > { %v2799_v53 = vpop.eup %2798 }
 0x663   : > { %v1467_v4 = vmul.f32 %v2799_v53, %v2797_v52 }
 0x665   : > { %2122 = vst [vmem:[%s1989_s21 + $0x28] sm:$0xff] %v1467_v4  ;;  %1548 = vmatmul.mubr.f32.vlgmr.msra.gmra.mrb[12].mxu0 %v1467_v4  ;;  %1619 = vmatmul.mubr.f32.vlgmr.msra.gmra.mrb[12].mxu1 %v1467_v4 }
 0x666   : > { %2602 = vmatpush1.bf16.msra.mxu0 %v3023_v40  ;;  %2634 = vmatpush1.bf16.msra.mxu1 %v3048_v57  ;;  %v2125_v40 = vld [vmem:[%s1993_s23 + $0xc8] sm:$0xff] }
 0x667   : > { %2604 = vmatprep.subr.bf16.mxu0 %v3025_v41  ;;  %2636 = vmatprep.subr.bf16.mxu1 %v3063_v1 }
 0x668   : > { %1733 = vmatprep.mubr.f32.mxu0 %v2872_v32  ;;  %1804 = vmatprep.mubr.f32.mxu1 %v2872_v32  ;;  %v2124_v32 = vld [vmem:[%s1993_s23 + $0xc0] sm:$0xff] }
 0x66a   : > { %2606 = vmatpush1.bf16.msra.mxu0 %v3033_v46  ;;  %2638 = vmatpush1.bf16.msra.mxu1 %v3068_v5 }
 0x66b   : > { %2608 = vmatprep.subr.bf16.mxu0 %v3038_v49  ;;  %2640 = vmatprep.subr.bf16.mxu1 %v3080_v13 }
 0x66e   : > { %2610 = vmatpush1.bf16.msra.mxu0 %v3051_v58  ;;  %2642 = vmatpush1.bf16.msra.mxu1 %v3087_v16 }
 0x66f   : > { %2612 = vmatprep.subr.bf16.mxu0 %v3058_v62  ;;  %2644 = vmatprep.subr.bf16.mxu1 %v3093_v20 }
 0x672   : > { %2614 = vmatpush1.bf16.msra.mxu0 %v3076_v10  ;;  %2646 = vmatpush1.bf16.msra.mxu1 %v3109_v30  ;;  %v2127_v10 = vld [vmem:[%s1993_s23 + $0xd8] sm:$0xff] }
 0x673   : > { %2616 = vmatprep.subr.bf16.mxu0 %v3083_v14  ;;  %2648 = vmatprep.subr.bf16.mxu1 %v3113_v33  ;;  %v2126_v14 = vld [vmem:[%s1993_s23 + $0xd0] sm:$0xff] }
 0x676   : > { %2618 = vmatpush1.bf16.msra.mxu0 %v3098_v23  ;;  %2650 = vmatpush1.bf16.msra.mxu1 %v3129_v47 }
 0x677   : > { %2620 = vmatprep.subr.bf16.mxu0 %v3103_v26  ;;  %2652 = vmatprep.subr.bf16.mxu1 %v3133_v50 }
 0x67a   : > { %2622 = vmatpush1.bf16.msra.mxu0 %v3120_v39  ;;  %2654 = vmatpush1.bf16.msra.mxu1 %v3148_v63 }
 0x67b   : > { %2624 = vmatprep.subr.bf16.mxu0 %v3123_v42  ;;  %2656 = vmatprep.subr.bf16.mxu1 %v3151_v0 }
 0x67e   : > { %2626 = vmatpush1.bf16.msra.mxu0 %v3140_v56  ;;  %2658 = vmatpush1.bf16.msra.mxu1 %v3162_v8 }
 0x67f   : > { %2628 = vmatprep.subr.bf16.mxu0 %v3143_v59  ;;  %2660 = vmatprep.subr.bf16.mxu1 %v3165_v9 }
 0x682   : > { %2630 = vmatpush1.bf16.msra.mxu0 %v3158_v7  ;;  %2662 = vmatpush1.bf16.msra.mxu1 %v3171_v15  ;;  %v2134_v15 = vld [vmem:[%s2001_s27 + $0xe0] sm:$0xff] }
 0x738   : > { %v1549_v41 = vpop.f32.mrb[12].mxu0  ;;  %v1620_v46 = vpop.f32.mrb[12].mxu1 }
 0x739   : > { %v1625_v49 = vadd.f32 %v2124_v32, %v1549_v41  ;;  %v1551_v57 = vpop.f32.mrb[13].mxu0  ;;  %v1622_v58 = vpop.f32.mrb[13].mxu1  ;;  %v1627_v20 = vadd.f32 %v2126_v14, %v1620_v46 }
 0x73a   : > { %v1626_v62 = vadd.f32 %v2125_v40, %v1551_v57  ;;  %v1628_v13 = vadd.f32 %v2127_v10, %v1622_v58 }
 0x73b   : > { %v2128_v1 = vmul.f32 -1.442695, %v1625_v49 }
 0x73c   : > { %v2129_v5 = vmul.f32 -1.442695, %v1626_v62  ;;  %v2130_v16 = vmul.f32 -1.442695, %v1628_v13 }
 0x73d   : > { %2800 = vpow2.f32 %v2128_v1 }
 0x73e   : > { %2802 = vpow2.f32 %v2129_v5 }
 0x73f   : > { %2804 = vpow2.f32 %v2130_v16 }
 0x740   : > { %2806 = vtanh.f32 %v1627_v20 }
 0x747   : > { %v2801_v23 = vpop.eup %2800 }
 0x748   : > { %v2803_v26 = vpop.eup %2802  ;;  %v1632_v30 = vadd.f32 1.0, %v2801_v23 }
 0x749   : > { %v1638_v33 = vadd.f32 1.0, %v2803_v26  ;;  %v2805_v39 = vpop.eup %2804 }
 0x74a   : > { %2808 = vrcp.f32 %v1632_v30  ;;  %v2807_v42 = vpop.eup %2806  ;;  %v1645_v59 = vadd.f32 1.0, %v2805_v39 }
 0x74b   : > { %2810 = vrcp.f32 %v1638_v33 }
 0x74c   : > { %2812 = vrcp.f32 %v1645_v59 }
 0x754   : > { %v2809_v47 = vpop.eup %2808 }
 0x755   : > { %v2811_v50 = vpop.eup %2810  ;;  %v1650_v56 = vmul.f32 %v2809_v47, %v2807_v42 }
 0x756   : > { %v1649_v63 = vmul.f32 %v2811_v50, %v3439_v51  ;;  %v2813_v7 = vpop.eup %2812 }
 0x758   : > { %v1651_v0 = vadd.f32 %v1650_v56, %v1649_v63 }
 0x75a   : > { %2814 = vtanh.f32 %v1651_v0 }
 0x764   : > { %v2815_v8 = vpop.eup %2814 }
 0x765   : > { %v1653_v9 = vmul.f32 %v2815_v8, %v2813_v7 }
 0x767   : > { %2132 = vst [vmem:[%s1997_s25 + $0x30] sm:$0xff] %v1653_v9  ;;  %1734 = vmatmul.mubr.f32.vlgmr.msra.gmra.mrb[14].mxu0 %v1653_v9  ;;  %1805 = vmatmul.mubr.f32.vlgmr.msra.gmra.mrb[14].mxu1 %v1653_v9 }
 0x83a   : > { %v1735_v6 = vpop.f32.mrb[14].mxu0  ;;  %v1806_v11 = vpop.f32.mrb[14].mxu1 }
 0x83b   : > { %v1811_v60 = vadd.f32 %v2134_v15, %v1735_v6  ;;  %v1737_v61 = vpop.f32.mrb[15].mxu0  ;;  %v1808_v2 = vpop.f32.mrb[15].mxu1  ;;  %v1813_v24 = vadd.f32 %v2136_v21, %v1806_v11 }
 0x83c   : > { %v1812_v3 = vadd.f32 %v2135_v55, %v1737_v61  ;;  %v1814_v19 = vadd.f32 %v2137_v18, %v1808_v2 }
 0x83d   : > { %v2138_v12 = vmul.f32 -1.442695, %v1811_v60 }
 0x83e   : > { %v2139_v17 = vmul.f32 -1.442695, %v1812_v3  ;;  %v2140_v22 = vmul.f32 -1.442695, %v1814_v19 }
 0x83f   : > { %2816 = vpow2.f32 %v2138_v12 }
 0x840   : > { %2818 = vpow2.f32 %v2139_v17 }
 0x841   : > { %2820 = vpow2.f32 %v2140_v22 }
 0x842   : > { %2822 = vtanh.f32 %v1813_v24 }
 0x849   : > { %v2817_v25 = vpop.eup %2816 }
 0x84a   : > { %v2819_v27 = vpop.eup %2818  ;;  %v1818_v36 = vadd.f32 1.0, %v2817_v25 }
 0x84b   : > { %v1824_v28 = vadd.f32 1.0, %v2819_v27  ;;  %v2821_v54 = vpop.eup %2820 }
 0x84c   : > { %2824 = vrcp.f32 %v1818_v36  ;;  %v2823_v29 = vpop.eup %2822  ;;  %v1831_v37 = vadd.f32 1.0, %v2821_v54 }
 0x84d   : > { %2826 = vrcp.f32 %v1824_v28 }
 0x84e   : > { %2828 = vrcp.f32 %v1831_v37 }
 0x856   : > { %v2825_v31 = vpop.eup %2824 }
 0x857   : > { %v2827_v34 = vpop.eup %2826  ;;  %v1836_v35 = vmul.f32 %v2825_v31, %v2823_v29 }
 0x858   : > { %v1835_v38 = vmul.f32 %v2827_v34, %v1651_v0  ;;  %v2829_v44 = vpop.eup %2828 }
 0x85a   : > { %v1837_v43 = vadd.f32 %v1836_v35, %v1835_v38 }
 0x85c   : > { %2830 = vtanh.f32 %v1837_v43 }
 0x863   : > { %1851 = sbr.rel (!%p2923_p6) target bundleno = 2165 (0x875), region = 59 }
 0x866   : > { %v2831_v45 = vpop.eup %2830 }
 0x867   : > { %v1839_v48 = vmul.f32 %v2831_v45, %v2829_v44 }
 0x869   : > { %2142 = vst [vmem:[%s2005_s28 + $0x38] sm:$0xff] %v1839_v48 }
 0x870   : > { %v1902_v51 = vld [vmem:[%s3226_s17] sm:$0xff]  ;;  %v1904_v52 = vld [vmem:[%s3226_s17 + $0x8] sm:$0xff]  ;;  %v1906_v53 = vld [vmem:[%s3226_s17 + $0x10] sm:$0xff] }
 0x871   : > { %1903 = vst [vmem:[%s1860_s4] sm:$0xff] %v1902_v51  ;;  %1905 = vst [vmem:[%s1860_s4 + $0x10] sm:$0xff] %v1904_v52  ;;  %v1908_v4 = vld [vmem:[%s3226_s17 + $0x18] sm:$0xff]  ;;  %v1910_v32 = vld [vmem:[%s3226_s17 + $0x20] sm:$0xff] }
 0x872   : > { %1907 = vst [vmem:[%s1860_s4 + $0x20] sm:$0xff] %v1906_v53  ;;  %v1912_v40 = vld [vmem:[%s3226_s17 + $0x28] sm:$0xff]  ;;  %1909 = vst [vmem:[%s1860_s4 + $0x30] sm:$0xff] %v1908_v4  ;;  %v1914_v41 = vld [vmem:[%s3226_s17 + $0x30] sm:$0xff] }
 0x873   : > { %1911 = vst [vmem:[%s1860_s4 + $0x40] sm:$0xff] %v1910_v32  ;;  %1913 = vst [vmem:[%s1860_s4 + $0x50] sm:$0xff] %v1912_v40  ;;  %v1916_v46 = vld [vmem:[%s3226_s17 + $0x38] sm:$0xff] }
 0x874   : > { %1915 = vst [vmem:[%s1860_s4 + $0x60] sm:$0xff] %v1914_v41  ;;  %1917 = vst [vmem:[%s1860_s4 + $0x70] sm:$0xff] %v1916_v46 }
 0x875 PF: > { %s12_s13 = sadd.s32 1, %s2870_s13   ;;  %s3519_s9 = smov %s2858_s10 }
 0x876   : > { %p9_p12 = scmp.ge.s32.totalorder %s12_s13, 4   ;;  %s3520_s10 = smov %s2928_s19 }
 0x877   : > { %s3521_s11 = smov %s2866_s12  ;;  %s3522_s12 = smov %s3524_s14 }
 0x878   :  { %11 = sbr.rel (!%p9_p12) target bundleno = 3 (0x3), region = 147 }

</bundles_post_ra>
